<compile_context>
chip_gen: v5e
topology: v5e:2x2
jax: 0.10.0
libtpu: 0.0.40
codegen_flags: <defaults>
</compile_context>

<pallas_src>
from functools import partial

import jax
import jax.numpy as jnp
from jax import lax
from jax.experimental import pallas as pl
from jax.experimental.pallas import tpu as pltpu


# ----------------------------------------------------------------------------
# Fused Pallas kernel: one grid step = one batch element, whole forward pass.
# ----------------------------------------------------------------------------
def _apl_fused_kernel(x_ref, pose_ref, valid_ref,
                      agg_ref, gcnw_ref, gcnb_ref,
                      w3_ref, suppb_ref,
                      wobj_ref, objb_ref,
                      wff_ref, f1p_ref, cb_ref,
                      out_ref, *, H, W, Cin, Cout):
    f32 = jnp.float32
    bf16 = jnp.bfloat16
    Wp = W + 2
    HWp = H * Wp          # number of computed "frame" rows (padded-width rows)

    # ---- pose branch (GCN stand-in) -> fuse_1 pose-half term, (1, Cout) ----
    pv = pose_ref[...]                                          # (T*V, Cp)
    y = jnp.dot(agg_ref[...], pv, preferred_element_type=f32)   # (T*V, Cp)
    z = jnp.dot(y, gcnw_ref[...], preferred_element_type=f32) + gcnb_ref[...]
    z = jnp.maximum(z, 0.0)                                     # (T*V, Cout)
    pose_vec = jnp.mean(z, axis=0, keepdims=True)               # (1, Cout)
    pose_term = jnp.dot(pose_vec, f1p_ref[...],
                        preferred_element_type=f32)             # (1, Cout)

    # ---- 3x3 convs: support_project (cols :Cout) and spatial_project folded
    #      into fuse_2 (cols Cout:), as 9 shifted-tap bf16 matmuls on the
    #      flat zero-padded layout, accumulated in f32 -----------------------
    acc = jnp.zeros((HWp, 2 * Cout), f32)
    for t in range(9):
        dy, dx = t // 3, t % 3
        lo = dy * Wp + dx
        xt = x_ref[lo:lo + HWp, :]                              # (HWp, Cin+2)
        acc = acc + jnp.dot(xt.astype(bf16), w3_ref[t],
                            preferred_element_type=f32)
    sp = acc[:, :Cout] + suppb_ref[...]                         # support_project
    spat_c = acc[:, Cout:]                                      # spat -> fuse_2

    # ---- obj_project on the o_box-masked support feature (1x1 conv) -------
    ctr = x_ref[Wp + 1:Wp + 1 + HWp, :]                         # un-shifted pixels
    sf_c = ctr[:, :Cin]                                         # (HWp, Cin)
    ob_c = ctr[:, Cin + 1:Cin + 2]                              # o_box (HWp, 1)
    om = jnp.dot((sf_c * ob_c).astype(bf16), wobj_ref[...],
                 preferred_element_type=f32) + objb_ref[...]    # (HWp, Cout)

    # ---- area / global obj pooling / spatial softmax attention ------------
    valid = valid_ref[...]                                      # (HWp, 1) 1/0
    area = jnp.sum(ob_c, axis=0, keepdims=True) + 0.0005        # (1, 1)
    obj = (jnp.sum(om * valid, axis=0, keepdims=True)
           * pl.reciprocal(area, approx=True))                  # (1, Cout)
    s = jnp.where(valid > 0.0, sp * obj, -1e30)                 # mask pad cols
    e = jnp.exp(s - jnp.max(s, axis=0, keepdims=True))
    attn = e * pl.reciprocal(jnp.sum(e, axis=0, keepdims=True), approx=True)
    s_obj = attn * sp                                           # (HWp, Cout)

    # ---- fuse_1 (sp half) + fuse_2 (S_obj half) as one widened-K matmul ----
    lhs = jnp.concatenate([sp, s_obj], axis=1).astype(bf16)     # (HWp, 2*Cout)
    out = (jnp.dot(lhs, wff_ref[...], preferred_element_type=f32)
           + spat_c + pose_term + cb_ref[...])
    out_ref[...] = out


# ----------------------------------------------------------------------------
# Wrapper: layout prep + algebraic weight folding, then a single pallas_call.
# ----------------------------------------------------------------------------
def apl_forward(params, support_feature, h_box, o_box, pose_input):
    """APL_module.forward — NCHW in / NCHW out (one fused Pallas kernel)."""
    B, Cin, H, W = support_feature.shape
    Cout = params["supp_b"].shape[0]
    _, Cp, T, V = pose_input.shape
    Wp = W + 2
    HWp = H * Wp
    L = (H + 2) * Wp + 2            # flat padded length (+1 guard row each end)
    Ca = Cin + 2
    f32 = jnp.float32
    bf16 = jnp.bfloat16

    # -- activations: channels-last, box channels appended, pad 1, flatten --
    sf = jnp.transpose(support_feature, (0, 2, 3, 1))
    hb = jnp.transpose(h_box, (0, 2, 3, 1))
    ob = jnp.transpose(o_box, (0, 2, 3, 1))
    xa = jnp.concatenate([sf, hb, ob], axis=-1)                 # (B, H, W, Ca)
    xa = jnp.pad(xa, ((0, 0), (1, 1), (1, 1), (0, 0)))          # (B, H+2, Wp, Ca)
    xflat = jnp.pad(xa.reshape(B, (H + 2) * Wp, Ca),
                    ((0, 0), (1, 1), (0, 0))).astype(f32)       # (B, L, Ca)

    # -- validity mask over the HWp computed rows (garbage pad columns -> 0) -
    col = jnp.arange(HWp, dtype=jnp.int32) % Wp
    valid = ((col >= 1) & (col <= W)).astype(f32).reshape(HWp, 1)

    # -- pose input as (B, T*V, Cp) + block-diagonal graph aggregation ------
    pose_tv = jnp.transpose(pose_input, (0, 2, 3, 1)).reshape(B, T * V, Cp)
    pose_tv = pose_tv.astype(f32)
    agg = jnp.kron(jnp.eye(T, dtype=f32), params["gcn_A"].T).astype(f32)

    # -- weight folding / packing (done once, in f32) ------------------------
    w_supp = params["supp_w"].reshape(9, Cin, Cout)             # HWIO taps
    fuse2_s = params["fuse2_w"][:Cout]                          # S_obj part
    fuse2_t = params["fuse2_w"][Cout:]                          # spat part (20,Cout)
    w_spat = params["spat_w"].reshape(9, 2, 20)
    w_spat_f = jnp.einsum("tij,jo->tio", w_spat, fuse2_t)       # (9, 2, Cout)
    w3 = jnp.concatenate(
        [jnp.concatenate([w_supp, jnp.zeros((9, Cin, Cout), f32)], axis=2),
         jnp.concatenate([jnp.zeros((9, 2, Cout), f32), w_spat_f], axis=2)],
        axis=1).astype(bf16)                                    # (9, Ca, 2*Cout)
    wff = jnp.concatenate([params["fuse1_w"][:Cout], fuse2_s],
                          axis=0).astype(bf16)                  # (2*Cout, Cout)
    const_b = (params["fuse1_b"] + params["fuse2_b"]
               + params["spat_b"] @ fuse2_t).reshape(1, Cout).astype(f32)

    gcn_w = params["gcn_w"].astype(f32)                         # (Cp, Cout)
    gcn_b = params["gcn_b"].reshape(1, Cout).astype(f32)
    supp_b = params["supp_b"].reshape(1, Cout).astype(f32)
    wobj = params["objp_w"].astype(bf16)                        # (Cin, Cout)
    objp_b = params["objp_b"].reshape(1, Cout).astype(f32)
    f1p = params["fuse1_w"][Cout:].astype(f32)                  # (Cout, Cout)

    kernel = partial(_apl_fused_kernel, H=H, W=W, Cin=Cin, Cout=Cout)

    out = pl.pallas_call(
        kernel,
        out_shape=jax.ShapeDtypeStruct((B, HWp, Cout), f32),
        grid_spec=pltpu.PrefetchScalarGridSpec(
            num_scalar_prefetch=0,
            grid=(B,),
            in_specs=[
                pl.BlockSpec((None, L, Ca), lambda b: (b, 0, 0)),         # x
                pl.BlockSpec((None, T * V, Cp), lambda b: (b, 0, 0)),     # pose
                pl.BlockSpec((HWp, 1), lambda b: (0, 0)),                 # valid
                pl.BlockSpec((T * V, T * V), lambda b: (0, 0)),           # agg
                pl.BlockSpec((Cp, Cout), lambda b: (0, 0)),               # gcn_w
                pl.BlockSpec((1, Cout), lambda b: (0, 0)),                # gcn_b
                pl.BlockSpec((9, Ca, 2 * Cout), lambda b: (0, 0, 0)),     # w3
                pl.BlockSpec((1, Cout), lambda b: (0, 0)),                # supp_b
                pl.BlockSpec((Cin, Cout), lambda b: (0, 0)),              # wobj
                pl.BlockSpec((1, Cout), lambda b: (0, 0)),                # objp_b
                pl.BlockSpec((2 * Cout, Cout), lambda b: (0, 0)),         # wff
                pl.BlockSpec((Cout, Cout), lambda b: (0, 0)),             # f1p
                pl.BlockSpec((1, Cout), lambda b: (0, 0)),                # const_b
            ],
            out_specs=pl.BlockSpec((None, HWp, Cout), lambda b: (b, 0, 0))),
        compiler_params=pltpu.CompilerParams(
            dimension_semantics=("parallel",)),
    )(xflat, pose_tv, valid, agg, gcn_w, gcn_b, w3, supp_b, wobj, objp_b,
      wff, f1p, const_b)

    # drop the padded columns (frame -> real HxW) and return NCHW
    out = out.reshape(B, H, Wp, Cout)[:, :, 1:1 + W, :]
    return jnp.transpose(out, (0, 3, 1, 2))


# ----------------------------------------------------------------------------
# Parameters
# ----------------------------------------------------------------------------
def init_params(key, Cin, Cout, Cp, V):
    ks = jax.random.split(key, 12)

    def w(k, shape, fan_in):
        return (jax.random.normal(k, shape, jnp.float32) /
                jnp.sqrt(jnp.float32(fan_in)))

    adjacency = ((jnp.eye(V) + jnp.ones((V, V)) / V) / 2.0).astype(jnp.float32)
    return dict(
        gcn_A=adjacency,                              # (V, V)
        gcn_w=w(ks[0], (Cp, Cout), Cp),               # pose channel mixing
        gcn_b=w(ks[1], (Cout,), Cout),
        supp_w=w(ks[2], (3, 3, Cin, Cout), 9 * Cin),  # support_project 3x3
        supp_b=w(ks[3], (Cout,), Cout),
        fuse1_w=w(ks[4], (2 * Cout, Cout), 2 * Cout),  # fuse_1 1x1
        fuse1_b=w(ks[5], (Cout,), Cout),
        objp_w=w(ks[6], (Cin, Cout), Cin),            # obj_project 1x1
        objp_b=w(ks[7], (Cout,), Cout),
        spat_w=w(ks[8], (3, 3, 2, 20), 18),           # spatial_project 3x3
        spat_b=w(ks[9], (20,), 20),
        fuse2_w=w(ks[10], (Cout + 20, Cout), Cout + 20),  # fuse_2 1x1
        fuse2_b=w(ks[11], (Cout,), Cout),
    )


# ----------------------------------------------------------------------------
# Pure-JAX reference (correctness check)
# ----------------------------------------------------------------------------
def _conv2d_ref(x_nchw, w_hwio, b, padding):
    out = lax.conv_general_dilated(
        x_nchw, w_hwio, window_strides=(1, 1),
        padding=[(padding, padding), (padding, padding)],
        dimension_numbers=("NCHW", "HWIO", "NCHW"),
        precision=lax.Precision.HIGHEST)
    return out + b.reshape(1, -1, 1, 1)


def _gcn_ref(params, pose_input):
    x = jnp.einsum("bctv,vw->bctw", pose_input, params["gcn_A"],
                   precision=lax.Precision.HIGHEST)
    x = jnp.einsum("bctv,co->botv", x, params["gcn_w"],
                   precision=lax.Precision.HIGHEST)
    x = jnp.maximum(x + params["gcn_b"].reshape(1, -1, 1, 1), 0.0)
    return jnp.mean(x, axis=2, keepdims=True)                   # (B,Cout,1,V)


def ref_forward(params, support_feature, h_box, o_box, pose_input):
    B, Cin, H, W = support_feature.shape
    Cout = params["supp_b"].shape[0]
    object_map = support_feature * o_box
    object_map = _conv2d_ref(object_map,
                             params["objp_w"].reshape(1, 1, Cin, Cout),
                             params["objp_b"], 0)
    sp = _conv2d_ref(support_feature, params["supp_w"], params["supp_b"], 1)
    pose = jnp.mean(_gcn_ref(params, pose_input), axis=3)       # (B,Cout,1)
    pose = jnp.broadcast_to(pose.reshape(B, Cout, 1, 1), (B, Cout, H, W))
    feature_1 = _conv2d_ref(jnp.concatenate([sp, pose], axis=1),
                            params["fuse1_w"].reshape(1, 1, 2 * Cout, Cout),
                            params["fuse1_b"], 0)
    area = jnp.mean(o_box, axis=(2, 3), keepdims=True) * H * W + 0.0005
    obj = jnp.mean(object_map, axis=(2, 3), keepdims=True) * W * H / area
    S = (sp * obj).reshape(B, Cout, H * W)
    S = jax.nn.softmax(S, axis=2).reshape(B, Cout, H, W) * sp
    spat = _conv2d_ref(jnp.concatenate([h_box, o_box], axis=1),
                       params["spat_w"], params["spat_b"], 1)
    feature_2 = _conv2d_ref(jnp.concatenate([S, spat], axis=1),
                            params["fuse2_w"].reshape(1, 1, Cout + 20, Cout),
                            params["fuse2_b"], 0)
    return feature_1 + feature_2


# ----------------------------------------------------------------------------
if __name__ == "__main__":
    # small shapes consistent with the module (input_channels->64,
    # output_channels->32, square 8x8 feature maps, pose (Cp=3, T=4, V=8))
    B, Cin, Cout, H, W = 2, 64, 32, 8, 8
    Cp, T, V = 3, 4, 8

    key = jax.random.PRNGKey(0)
    k_par, k_sf, k_pose = jax.random.split(key, 3)

    params = init_params(k_par, Cin, Cout, Cp, V)

    support_feature = jax.random.normal(k_sf, (B, Cin, H, W), jnp.float32)
    pose_input = jax.random.normal(k_pose, (B, Cp, T, V), jnp.float32)
    h_box = jnp.zeros((B, 1, H, W), jnp.float32).at[:, :, 1:6, 2:7].set(1.0)
    o_box = jnp.zeros((B, 1, H, W), jnp.float32).at[:, :, 3:8, 0:5].set(1.0)

    out = jax.jit(apl_forward)(params, support_feature, h_box, o_box,
                               pose_input)
    out = jax.block_until_ready(out)

    assert out.shape == (B, Cout, H, W)
    assert bool(jnp.all(jnp.isfinite(out)))

    # bf16 MXU operands + approximate reciprocals -> relaxed tolerance
    ref = ref_forward(params, support_feature, h_box, o_box, pose_input)
    err = float(jnp.max(jnp.abs(out - ref)))
    assert err < 5e-2, f"max abs err {err}"

    print("KERNEL_OK")
</pallas_src>

<mosaic_0001>
module attributes {stable_mosaic.version = 11 : i64} {
  func.func @_apl_fused_kernel(%arg0: i32, %arg1: memref<1x102x66xf32, #tpu.memory_space<vmem>>, %arg2: memref<1x32x3xf32, #tpu.memory_space<vmem>>, %arg3: memref<80x1xf32, #tpu.memory_space<vmem>>, %arg4: memref<32x32xf32, #tpu.memory_space<vmem>>, %arg5: memref<3x32xf32, #tpu.memory_space<vmem>>, %arg6: memref<1x32xf32, #tpu.memory_space<vmem>>, %arg7: memref<9x66x64xbf16, #tpu.memory_space<vmem>>, %arg8: memref<1x32xf32, #tpu.memory_space<vmem>>, %arg9: memref<64x32xbf16, #tpu.memory_space<vmem>>, %arg10: memref<1x32xf32, #tpu.memory_space<vmem>>, %arg11: memref<64x32xbf16, #tpu.memory_space<vmem>>, %arg12: memref<32x32xf32, #tpu.memory_space<vmem>>, %arg13: memref<1x32xf32, #tpu.memory_space<vmem>>, %arg14: memref<1x80x32xf32, #tpu.memory_space<vmem>>) attributes {dimension_semantics = [#tpu.dimension_semantics<parallel>], iteration_bounds = array<i64: 2>, scalar_prefetch = 0 : i64, scratch_operands = 0 : i64, tpu.core_type = #tpu.core_type<tc>, window_params = [{transform_indices = @transform_0, window_bounds = array<i64: 1, 102, 66>}, {transform_indices = @transform_1, window_bounds = array<i64: 1, 32, 3>}, {pipeline_mode = #tpu.pipeline_mode<synchronous>, transform_indices = @transform_2, window_bounds = array<i64: 80, 1>}, {pipeline_mode = #tpu.pipeline_mode<synchronous>, transform_indices = @transform_3, window_bounds = array<i64: 32, 32>}, {pipeline_mode = #tpu.pipeline_mode<synchronous>, transform_indices = @transform_4, window_bounds = array<i64: 3, 32>}, {pipeline_mode = #tpu.pipeline_mode<synchronous>, transform_indices = @transform_5, window_bounds = array<i64: 1, 32>}, {pipeline_mode = #tpu.pipeline_mode<synchronous>, transform_indices = @transform_6, window_bounds = array<i64: 9, 66, 64>}, {pipeline_mode = #tpu.pipeline_mode<synchronous>, transform_indices = @transform_7, window_bounds = array<i64: 1, 32>}, {pipeline_mode = #tpu.pipeline_mode<synchronous>, transform_indices = @transform_8, window_bounds = array<i64: 64, 32>}, {pipeline_mode = #tpu.pipeline_mode<synchronous>, transform_indices = @transform_9, window_bounds = array<i64: 1, 32>}, {pipeline_mode = #tpu.pipeline_mode<synchronous>, transform_indices = @transform_10, window_bounds = array<i64: 64, 32>}, {pipeline_mode = #tpu.pipeline_mode<synchronous>, transform_indices = @transform_11, window_bounds = array<i64: 32, 32>}, {pipeline_mode = #tpu.pipeline_mode<synchronous>, transform_indices = @transform_12, window_bounds = array<i64: 1, 32>}, {transform_indices = @transform_13, window_bounds = array<i64: 1, 80, 32>}]} {
    %c0 = arith.constant 0 : index
    %c0_0 = arith.constant 0 : index
    %c0_1 = arith.constant 0 : index
    %0 = vector.load %arg2[%c0, %c0_0, %c0_1] : memref<1x32x3xf32, #tpu.memory_space<vmem>>, vector<1x32x3xf32>
    %1 = vector.shape_cast %0 : vector<1x32x3xf32> to vector<32x3xf32>
    %c0_2 = arith.constant 0 : index
    %c0_3 = arith.constant 0 : index
    %2 = vector.load %arg4[%c0_2, %c0_3] : memref<32x32xf32, #tpu.memory_space<vmem>>, vector<32x32xf32>
    %cst = arith.constant dense<0.000000e+00> : vector<32x3xf32>
    %3 = tpu.matmul %2, %1, %cst {dimension_numbers = #tpu.dot_dimension_numbers<[1], [0], [0], [1], [0, 0, 1, 1], [], []>} : vector<32x32xf32>, vector<32x3xf32>, vector<32x3xf32> -> vector<32x3xf32>
    %c0_4 = arith.constant 0 : index
    %c0_5 = arith.constant 0 : index
    %4 = vector.load %arg5[%c0_4, %c0_5] : memref<3x32xf32, #tpu.memory_space<vmem>>, vector<3x32xf32>
    %cst_6 = arith.constant dense<0.000000e+00> : vector<32x32xf32>
    %5 = tpu.matmul %3, %4, %cst_6 {dimension_numbers = #tpu.dot_dimension_numbers<[1], [0], [0], [1], [0, 0, 1, 1], [], []>} : vector<32x3xf32>, vector<3x32xf32>, vector<32x32xf32> -> vector<32x32xf32>
    %c0_7 = arith.constant 0 : index
    %c0_8 = arith.constant 0 : index
    %6 = vector.load %arg6[%c0_7, %c0_8] : memref<1x32xf32, #tpu.memory_space<vmem>>, vector<1x32xf32>
    %7 = vector.broadcast %6 : vector<1x32xf32> to vector<32x32xf32>
    %8 = arith.addf %5, %7 : vector<32x32xf32>
    %cst_9 = arith.constant 0.000000e+00 : f32
    %9 = vector.broadcast %cst_9 : f32 to vector<32x32xf32>
    %10 = arith.maximumf %8, %9 : vector<32x32xf32>
    %cst_10 = arith.constant dense<0.000000e+00> : vector<32xf32>
    %11 = vector.multi_reduction <add>, %10, %cst_10 [0] : vector<32x32xf32> to vector<32xf32>
    %12 = vector.shape_cast %11 : vector<32xf32> to vector<1x32xf32>
    %cst_11 = arith.constant 3.200000e+01 : f32
    %13 = vector.broadcast %cst_11 : f32 to vector<1x32xf32>
    %14 = arith.divf %12, %13 : vector<1x32xf32>
    %c0_12 = arith.constant 0 : index
    %c0_13 = arith.constant 0 : index
    %15 = vector.load %arg12[%c0_12, %c0_13] : memref<32x32xf32, #tpu.memory_space<vmem>>, vector<32x32xf32>
    %cst_14 = arith.constant dense<0.000000e+00> : vector<1x32xf32>
    %16 = tpu.matmul %14, %15, %cst_14 {dimension_numbers = #tpu.dot_dimension_numbers<[1], [0], [0], [1], [0, 0, 1, 1], [], []>} : vector<1x32xf32>, vector<32x32xf32>, vector<1x32xf32> -> vector<1x32xf32>
    %cst_15 = arith.constant 0.000000e+00 : f32
    %17 = vector.broadcast %cst_15 : f32 to vector<80x64xf32>
    %c0_16 = arith.constant 0 : index
    %c0_17 = arith.constant 0 : index
    %c0_18 = arith.constant 0 : index
    %18 = vector.load %arg1[%c0_16, %c0_17, %c0_18] : memref<1x102x66xf32, #tpu.memory_space<vmem>>, vector<1x80x66xf32>
    %19 = vector.shape_cast %18 : vector<1x80x66xf32> to vector<80x66xf32>
    %20 = arith.truncf %19 : vector<80x66xf32> to vector<80x66xbf16>
    %c0_19 = arith.constant 0 : index
    %c0_20 = arith.constant 0 : index
    %c0_21 = arith.constant 0 : index
    %21 = vector.load %arg7[%c0_19, %c0_20, %c0_21] : memref<9x66x64xbf16, #tpu.memory_space<vmem>>, vector<1x66x64xbf16>
    %22 = vector.shape_cast %21 : vector<1x66x64xbf16> to vector<66x64xbf16>
    %cst_22 = arith.constant dense<0.000000e+00> : vector<80x64xf32>
    %23 = tpu.matmul %20, %22, %cst_22 {dimension_numbers = #tpu.dot_dimension_numbers<[1], [0], [0], [1], [0, 0, 1, 1], [], []>} : vector<80x66xbf16>, vector<66x64xbf16>, vector<80x64xf32> -> vector<80x64xf32>
    %24 = arith.addf %17, %23 : vector<80x64xf32>
    %c0_23 = arith.constant 0 : index
    %c1 = arith.constant 1 : index
    %c0_24 = arith.constant 0 : index
    %25 = vector.load %arg1[%c0_23, %c1, %c0_24] : memref<1x102x66xf32, #tpu.memory_space<vmem>>, vector<1x80x66xf32>
    %26 = vector.shape_cast %25 : vector<1x80x66xf32> to vector<80x66xf32>
    %27 = arith.truncf %26 : vector<80x66xf32> to vector<80x66xbf16>
    %c1_25 = arith.constant 1 : index
    %c0_26 = arith.constant 0 : index
    %c0_27 = arith.constant 0 : index
    %28 = vector.load %arg7[%c1_25, %c0_26, %c0_27] : memref<9x66x64xbf16, #tpu.memory_space<vmem>>, vector<1x66x64xbf16>
    %29 = vector.shape_cast %28 : vector<1x66x64xbf16> to vector<66x64xbf16>
    %cst_28 = arith.constant dense<0.000000e+00> : vector<80x64xf32>
    %30 = tpu.matmul %27, %29, %cst_28 {dimension_numbers = #tpu.dot_dimension_numbers<[1], [0], [0], [1], [0, 0, 1, 1], [], []>} : vector<80x66xbf16>, vector<66x64xbf16>, vector<80x64xf32> -> vector<80x64xf32>
    %31 = arith.addf %24, %30 : vector<80x64xf32>
    %c0_29 = arith.constant 0 : index
    %c2 = arith.constant 2 : index
    %c0_30 = arith.constant 0 : index
    %32 = vector.load %arg1[%c0_29, %c2, %c0_30] : memref<1x102x66xf32, #tpu.memory_space<vmem>>, vector<1x80x66xf32>
    %33 = vector.shape_cast %32 : vector<1x80x66xf32> to vector<80x66xf32>
    %34 = arith.truncf %33 : vector<80x66xf32> to vector<80x66xbf16>
    %c2_31 = arith.constant 2 : index
    %c0_32 = arith.constant 0 : index
    %c0_33 = arith.constant 0 : index
    %35 = vector.load %arg7[%c2_31, %c0_32, %c0_33] : memref<9x66x64xbf16, #tpu.memory_space<vmem>>, vector<1x66x64xbf16>
    %36 = vector.shape_cast %35 : vector<1x66x64xbf16> to vector<66x64xbf16>
    %cst_34 = arith.constant dense<0.000000e+00> : vector<80x64xf32>
    %37 = tpu.matmul %34, %36, %cst_34 {dimension_numbers = #tpu.dot_dimension_numbers<[1], [0], [0], [1], [0, 0, 1, 1], [], []>} : vector<80x66xbf16>, vector<66x64xbf16>, vector<80x64xf32> -> vector<80x64xf32>
    %38 = arith.addf %31, %37 : vector<80x64xf32>
    %c0_35 = arith.constant 0 : index
    %c10 = arith.constant 10 : index
    %c0_36 = arith.constant 0 : index
    %39 = vector.load %arg1[%c0_35, %c10, %c0_36] : memref<1x102x66xf32, #tpu.memory_space<vmem>>, vector<1x80x66xf32>
    %40 = vector.shape_cast %39 : vector<1x80x66xf32> to vector<80x66xf32>
    %41 = arith.truncf %40 : vector<80x66xf32> to vector<80x66xbf16>
    %c3 = arith.constant 3 : index
    %c0_37 = arith.constant 0 : index
    %c0_38 = arith.constant 0 : index
    %42 = vector.load %arg7[%c3, %c0_37, %c0_38] : memref<9x66x64xbf16, #tpu.memory_space<vmem>>, vector<1x66x64xbf16>
    %43 = vector.shape_cast %42 : vector<1x66x64xbf16> to vector<66x64xbf16>
    %cst_39 = arith.constant dense<0.000000e+00> : vector<80x64xf32>
    %44 = tpu.matmul %41, %43, %cst_39 {dimension_numbers = #tpu.dot_dimension_numbers<[1], [0], [0], [1], [0, 0, 1, 1], [], []>} : vector<80x66xbf16>, vector<66x64xbf16>, vector<80x64xf32> -> vector<80x64xf32>
    %45 = arith.addf %38, %44 : vector<80x64xf32>
    %c0_40 = arith.constant 0 : index
    %c11 = arith.constant 11 : index
    %c0_41 = arith.constant 0 : index
    %46 = vector.load %arg1[%c0_40, %c11, %c0_41] : memref<1x102x66xf32, #tpu.memory_space<vmem>>, vector<1x80x66xf32>
    %47 = vector.shape_cast %46 : vector<1x80x66xf32> to vector<80x66xf32>
    %48 = arith.truncf %47 : vector<80x66xf32> to vector<80x66xbf16>
    %c4 = arith.constant 4 : index
    %c0_42 = arith.constant 0 : index
    %c0_43 = arith.constant 0 : index
    %49 = vector.load %arg7[%c4, %c0_42, %c0_43] : memref<9x66x64xbf16, #tpu.memory_space<vmem>>, vector<1x66x64xbf16>
    %50 = vector.shape_cast %49 : vector<1x66x64xbf16> to vector<66x64xbf16>
    %cst_44 = arith.constant dense<0.000000e+00> : vector<80x64xf32>
    %51 = tpu.matmul %48, %50, %cst_44 {dimension_numbers = #tpu.dot_dimension_numbers<[1], [0], [0], [1], [0, 0, 1, 1], [], []>} : vector<80x66xbf16>, vector<66x64xbf16>, vector<80x64xf32> -> vector<80x64xf32>
    %52 = arith.addf %45, %51 : vector<80x64xf32>
    %c0_45 = arith.constant 0 : index
    %c12 = arith.constant 12 : index
    %c0_46 = arith.constant 0 : index
    %53 = vector.load %arg1[%c0_45, %c12, %c0_46] : memref<1x102x66xf32, #tpu.memory_space<vmem>>, vector<1x80x66xf32>
    %54 = vector.shape_cast %53 : vector<1x80x66xf32> to vector<80x66xf32>
    %55 = arith.truncf %54 : vector<80x66xf32> to vector<80x66xbf16>
    %c5 = arith.constant 5 : index
    %c0_47 = arith.constant 0 : index
    %c0_48 = arith.constant 0 : index
    %56 = vector.load %arg7[%c5, %c0_47, %c0_48] : memref<9x66x64xbf16, #tpu.memory_space<vmem>>, vector<1x66x64xbf16>
    %57 = vector.shape_cast %56 : vector<1x66x64xbf16> to vector<66x64xbf16>
    %cst_49 = arith.constant dense<0.000000e+00> : vector<80x64xf32>
    %58 = tpu.matmul %55, %57, %cst_49 {dimension_numbers = #tpu.dot_dimension_numbers<[1], [0], [0], [1], [0, 0, 1, 1], [], []>} : vector<80x66xbf16>, vector<66x64xbf16>, vector<80x64xf32> -> vector<80x64xf32>
    %59 = arith.addf %52, %58 : vector<80x64xf32>
    %c0_50 = arith.constant 0 : index
    %c20 = arith.constant 20 : index
    %c0_51 = arith.constant 0 : index
    %60 = vector.load %arg1[%c0_50, %c20, %c0_51] : memref<1x102x66xf32, #tpu.memory_space<vmem>>, vector<1x80x66xf32>
    %61 = vector.shape_cast %60 : vector<1x80x66xf32> to vector<80x66xf32>
    %62 = arith.truncf %61 : vector<80x66xf32> to vector<80x66xbf16>
    %c6 = arith.constant 6 : index
    %c0_52 = arith.constant 0 : index
    %c0_53 = arith.constant 0 : index
    %63 = vector.load %arg7[%c6, %c0_52, %c0_53] : memref<9x66x64xbf16, #tpu.memory_space<vmem>>, vector<1x66x64xbf16>
    %64 = vector.shape_cast %63 : vector<1x66x64xbf16> to vector<66x64xbf16>
    %cst_54 = arith.constant dense<0.000000e+00> : vector<80x64xf32>
    %65 = tpu.matmul %62, %64, %cst_54 {dimension_numbers = #tpu.dot_dimension_numbers<[1], [0], [0], [1], [0, 0, 1, 1], [], []>} : vector<80x66xbf16>, vector<66x64xbf16>, vector<80x64xf32> -> vector<80x64xf32>
    %66 = arith.addf %59, %65 : vector<80x64xf32>
    %c0_55 = arith.constant 0 : index
    %c21 = arith.constant 21 : index
    %c0_56 = arith.constant 0 : index
    %67 = vector.load %arg1[%c0_55, %c21, %c0_56] : memref<1x102x66xf32, #tpu.memory_space<vmem>>, vector<1x80x66xf32>
    %68 = vector.shape_cast %67 : vector<1x80x66xf32> to vector<80x66xf32>
    %69 = arith.truncf %68 : vector<80x66xf32> to vector<80x66xbf16>
    %c7 = arith.constant 7 : index
    %c0_57 = arith.constant 0 : index
    %c0_58 = arith.constant 0 : index
    %70 = vector.load %arg7[%c7, %c0_57, %c0_58] : memref<9x66x64xbf16, #tpu.memory_space<vmem>>, vector<1x66x64xbf16>
    %71 = vector.shape_cast %70 : vector<1x66x64xbf16> to vector<66x64xbf16>
    %cst_59 = arith.constant dense<0.000000e+00> : vector<80x64xf32>
    %72 = tpu.matmul %69, %71, %cst_59 {dimension_numbers = #tpu.dot_dimension_numbers<[1], [0], [0], [1], [0, 0, 1, 1], [], []>} : vector<80x66xbf16>, vector<66x64xbf16>, vector<80x64xf32> -> vector<80x64xf32>
    %73 = arith.addf %66, %72 : vector<80x64xf32>
    %c0_60 = arith.constant 0 : index
    %c22 = arith.constant 22 : index
    %c0_61 = arith.constant 0 : index
    %74 = vector.load %arg1[%c0_60, %c22, %c0_61] : memref<1x102x66xf32, #tpu.memory_space<vmem>>, vector<1x80x66xf32>
    %75 = vector.shape_cast %74 : vector<1x80x66xf32> to vector<80x66xf32>
    %76 = arith.truncf %75 : vector<80x66xf32> to vector<80x66xbf16>
    %c8 = arith.constant 8 : index
    %c0_62 = arith.constant 0 : index
    %c0_63 = arith.constant 0 : index
    %77 = vector.load %arg7[%c8, %c0_62, %c0_63] : memref<9x66x64xbf16, #tpu.memory_space<vmem>>, vector<1x66x64xbf16>
    %78 = vector.shape_cast %77 : vector<1x66x64xbf16> to vector<66x64xbf16>
    %cst_64 = arith.constant dense<0.000000e+00> : vector<80x64xf32>
    %79 = tpu.matmul %76, %78, %cst_64 {dimension_numbers = #tpu.dot_dimension_numbers<[1], [0], [0], [1], [0, 0, 1, 1], [], []>} : vector<80x66xbf16>, vector<66x64xbf16>, vector<80x64xf32> -> vector<80x64xf32>
    %80 = arith.addf %73, %79 : vector<80x64xf32>
    %81 = vector.extract_strided_slice %80 {offsets = [0, 0], sizes = [80, 32], strides = [1, 1]} : vector<80x64xf32> to vector<80x32xf32>
    %c0_65 = arith.constant 0 : index
    %c0_66 = arith.constant 0 : index
    %82 = vector.load %arg8[%c0_65, %c0_66] : memref<1x32xf32, #tpu.memory_space<vmem>>, vector<1x32xf32>
    %83 = vector.broadcast %82 : vector<1x32xf32> to vector<80x32xf32>
    %84 = arith.addf %81, %83 : vector<80x32xf32>
    %85 = vector.extract_strided_slice %80 {offsets = [0, 32], sizes = [80, 32], strides = [1, 1]} : vector<80x64xf32> to vector<80x32xf32>
    %c0_67 = arith.constant 0 : index
    %c11_68 = arith.constant 11 : index
    %c0_69 = arith.constant 0 : index
    %86 = vector.load %arg1[%c0_67, %c11_68, %c0_69] : memref<1x102x66xf32, #tpu.memory_space<vmem>>, vector<1x80x66xf32>
    %87 = vector.shape_cast %86 : vector<1x80x66xf32> to vector<80x66xf32>
    %88 = vector.extract_strided_slice %87 {offsets = [0, 0], sizes = [80, 64], strides = [1, 1]} : vector<80x66xf32> to vector<80x64xf32>
    %89 = vector.extract_strided_slice %87 {offsets = [0, 65], sizes = [80, 1], strides = [1, 1]} : vector<80x66xf32> to vector<80x1xf32>
    %90 = vector.broadcast %89 : vector<80x1xf32> to vector<80x64xf32>
    %91 = arith.mulf %88, %90 : vector<80x64xf32>
    %92 = arith.truncf %91 : vector<80x64xf32> to vector<80x64xbf16>
    %c0_70 = arith.constant 0 : index
    %c0_71 = arith.constant 0 : index
    %93 = vector.load %arg9[%c0_70, %c0_71] : memref<64x32xbf16, #tpu.memory_space<vmem>>, vector<64x32xbf16>
    %cst_72 = arith.constant dense<0.000000e+00> : vector<80x32xf32>
    %94 = tpu.matmul %92, %93, %cst_72 {dimension_numbers = #tpu.dot_dimension_numbers<[1], [0], [0], [1], [0, 0, 1, 1], [], []>} : vector<80x64xbf16>, vector<64x32xbf16>, vector<80x32xf32> -> vector<80x32xf32>
    %c0_73 = arith.constant 0 : index
    %c0_74 = arith.constant 0 : index
    %95 = vector.load %arg10[%c0_73, %c0_74] : memref<1x32xf32, #tpu.memory_space<vmem>>, vector<1x32xf32>
    %96 = vector.broadcast %95 : vector<1x32xf32> to vector<80x32xf32>
    %97 = arith.addf %94, %96 : vector<80x32xf32>
    %c0_75 = arith.constant 0 : index
    %c0_76 = arith.constant 0 : index
    %98 = vector.load %arg3[%c0_75, %c0_76] : memref<80x1xf32, #tpu.memory_space<vmem>>, vector<80x1xf32>
    %cst_77 = arith.constant dense<0.000000e+00> : vector<1xf32>
    %99 = vector.multi_reduction <add>, %89, %cst_77 [0] : vector<80x1xf32> to vector<1xf32>
    %100 = vector.shape_cast %99 : vector<1xf32> to vector<1x1xf32>
    %cst_78 = arith.constant 5.000000e-04 : f32
    %101 = vector.broadcast %cst_78 : f32 to vector<1x1xf32>
    %102 = arith.addf %100, %101 : vector<1x1xf32>
    %103 = vector.broadcast %98 : vector<80x1xf32> to vector<80x32xf32>
    %104 = arith.mulf %97, %103 : vector<80x32xf32>
    %cst_79 = arith.constant dense<0.000000e+00> : vector<32xf32>
    %105 = vector.multi_reduction <add>, %104, %cst_79 [0] : vector<80x32xf32> to vector<32xf32>
    %106 = vector.shape_cast %105 : vector<32xf32> to vector<1x32xf32>
    %107 = tpu.reciprocal %102 {approx = true} : vector<1x1xf32> -> vector<1x1xf32>
    %108 = vector.broadcast %107 : vector<1x1xf32> to vector<1x32xf32>
    %109 = arith.mulf %106, %108 : vector<1x32xf32>
    %cst_80 = arith.constant 0.000000e+00 : f32
    %110 = vector.broadcast %cst_80 : f32 to vector<80x1xf32>
    %111 = arith.cmpf ogt, %98, %110 : vector<80x1xf32>
    %112 = vector.broadcast %109 : vector<1x32xf32> to vector<80x32xf32>
    %113 = arith.mulf %84, %112 : vector<80x32xf32>
    %cst_81 = arith.constant -1.000000e+30 : f32
    %114 = vector.shape_cast %111 : vector<80x1xi1> to vector<80x1xi1>
    %115 = vector.broadcast %114 : vector<80x1xi1> to vector<80x32xi1>
    %116 = vector.broadcast %cst_81 : f32 to vector<80x32xf32>
    %117 = arith.select %115, %113, %116 : vector<80x32xi1>, vector<80x32xf32>
    %cst_82 = arith.constant dense<0xFF800000> : vector<32xf32>
    %118 = vector.multi_reduction <maximumf>, %117, %cst_82 [0] : vector<80x32xf32> to vector<32xf32>
    %119 = vector.shape_cast %118 : vector<32xf32> to vector<1x32xf32>
    %120 = vector.broadcast %119 : vector<1x32xf32> to vector<80x32xf32>
    %121 = arith.subf %117, %120 : vector<80x32xf32>
    %122 = math.exp %121 : vector<80x32xf32>
    %cst_83 = arith.constant dense<0.000000e+00> : vector<32xf32>
    %123 = vector.multi_reduction <add>, %122, %cst_83 [0] : vector<80x32xf32> to vector<32xf32>
    %124 = vector.shape_cast %123 : vector<32xf32> to vector<1x32xf32>
    %125 = tpu.reciprocal %124 {approx = true} : vector<1x32xf32> -> vector<1x32xf32>
    %126 = vector.broadcast %125 : vector<1x32xf32> to vector<80x32xf32>
    %127 = arith.mulf %122, %126 : vector<80x32xf32>
    %128 = arith.mulf %127, %84 : vector<80x32xf32>
    %129 = tpu.concatenate %84, %128 in 1 : vector<80x32xf32>, vector<80x32xf32> -> vector<80x64xf32>
    %130 = arith.truncf %129 : vector<80x64xf32> to vector<80x64xbf16>
    %c0_84 = arith.constant 0 : index
    %c0_85 = arith.constant 0 : index
    %131 = vector.load %arg11[%c0_84, %c0_85] : memref<64x32xbf16, #tpu.memory_space<vmem>>, vector<64x32xbf16>
    %cst_86 = arith.constant dense<0.000000e+00> : vector<80x32xf32>
    %132 = tpu.matmul %130, %131, %cst_86 {dimension_numbers = #tpu.dot_dimension_numbers<[1], [0], [0], [1], [0, 0, 1, 1], [], []>} : vector<80x64xbf16>, vector<64x32xbf16>, vector<80x32xf32> -> vector<80x32xf32>
    %133 = arith.addf %132, %85 : vector<80x32xf32>
    %134 = vector.broadcast %16 : vector<1x32xf32> to vector<80x32xf32>
    %135 = arith.addf %133, %134 : vector<80x32xf32>
    %c0_87 = arith.constant 0 : index
    %c0_88 = arith.constant 0 : index
    %136 = vector.load %arg13[%c0_87, %c0_88] : memref<1x32xf32, #tpu.memory_space<vmem>>, vector<1x32xf32>
    %137 = vector.broadcast %136 : vector<1x32xf32> to vector<80x32xf32>
    %138 = arith.addf %135, %137 : vector<80x32xf32>
    %c0_89 = arith.constant 0 : index
    %c0_90 = arith.constant 0 : index
    %c0_91 = arith.constant 0 : index
    %139 = vector.load %arg14[%c0_89, %c0_90, %c0_91] : memref<1x80x32xf32, #tpu.memory_space<vmem>>, vector<1x80x32xf32>
    %140 = vector.shape_cast %139 : vector<1x80x32xf32> to vector<80x32xf32>
    %141 = vector.shape_cast %138 : vector<80x32xf32> to vector<1x80x32xf32>
    tpu.vector_store %arg14[%c0_89, %c0_90, %c0_91], %141 {strides = array<i32>} : memref<1x80x32xf32, #tpu.memory_space<vmem>>, vector<1x80x32xf32>,
    return
  }
  func.func @transform_0(%arg0: i32) -> (i32, i32, i32) {
    %c0_i32 = arith.constant 0 : i32
    %c0_i32_0 = arith.constant 0 : i32
    %c0_i32_1 = arith.constant 0 : i32
    return %arg0, %c0_i32, %c0_i32_0 : i32, i32, i32
  }
  func.func @transform_1(%arg0: i32) -> (i32, i32, i32) {
    %c0_i32 = arith.constant 0 : i32
    %c0_i32_0 = arith.constant 0 : i32
    %c0_i32_1 = arith.constant 0 : i32
    return %arg0, %c0_i32, %c0_i32_0 : i32, i32, i32
  }
  func.func @transform_2(%arg0: i32) -> (i32, i32) {
    %c0_i32 = arith.constant 0 : i32
    %c0_i32_0 = arith.constant 0 : i32
    %c0_i32_1 = arith.constant 0 : i32
    return %c0_i32, %c0_i32_0 : i32, i32
  }
  func.func @transform_3(%arg0: i32) -> (i32, i32) {
    %c0_i32 = arith.constant 0 : i32
    %c0_i32_0 = arith.constant 0 : i32
    %c0_i32_1 = arith.constant 0 : i32
    return %c0_i32, %c0_i32_0 : i32, i32
  }
  func.func @transform_4(%arg0: i32) -> (i32, i32) {
    %c0_i32 = arith.constant 0 : i32
    %c0_i32_0 = arith.constant 0 : i32
    %c0_i32_1 = arith.constant 0 : i32
    return %c0_i32, %c0_i32_0 : i32, i32
  }
  func.func @transform_5(%arg0: i32) -> (i32, i32) {
    %c0_i32 = arith.constant 0 : i32
    %c0_i32_0 = arith.constant 0 : i32
    %c0_i32_1 = arith.constant 0 : i32
    return %c0_i32, %c0_i32_0 : i32, i32
  }
  func.func @transform_6(%arg0: i32) -> (i32, i32, i32) {
    %c0_i32 = arith.constant 0 : i32
    %c0_i32_0 = arith.constant 0 : i32
    %c0_i32_1 = arith.constant 0 : i32
    %c0_i32_2 = arith.constant 0 : i32
    return %c0_i32, %c0_i32_0, %c0_i32_1 : i32, i32, i32
  }
  func.func @transform_7(%arg0: i32) -> (i32, i32) {
    %c0_i32 = arith.constant 0 : i32
    %c0_i32_0 = arith.constant 0 : i32
    %c0_i32_1 = arith.constant 0 : i32
    return %c0_i32, %c0_i32_0 : i32, i32
  }
  func.func @transform_8(%arg0: i32) -> (i32, i32) {
    %c0_i32 = arith.constant 0 : i32
    %c0_i32_0 = arith.constant 0 : i32
    %c0_i32_1 = arith.constant 0 : i32
    return %c0_i32, %c0_i32_0 : i32, i32
  }
  func.func @transform_9(%arg0: i32) -> (i32, i32) {
    %c0_i32 = arith.constant 0 : i32
    %c0_i32_0 = arith.constant 0 : i32
    %c0_i32_1 = arith.constant 0 : i32
    return %c0_i32, %c0_i32_0 : i32, i32
  }
  func.func @transform_10(%arg0: i32) -> (i32, i32) {
    %c0_i32 = arith.constant 0 : i32
    %c0_i32_0 = arith.constant 0 : i32
    %c0_i32_1 = arith.constant 0 : i32
    return %c0_i32, %c0_i32_0 : i32, i32
  }
  func.func @transform_11(%arg0: i32) -> (i32, i32) {
    %c0_i32 = arith.constant 0 : i32
    %c0_i32_0 = arith.constant 0 : i32
    %c0_i32_1 = arith.constant 0 : i32
    return %c0_i32, %c0_i32_0 : i32, i32
  }
  func.func @transform_12(%arg0: i32) -> (i32, i32) {
    %c0_i32 = arith.constant 0 : i32
    %c0_i32_0 = arith.constant 0 : i32
    %c0_i32_1 = arith.constant 0 : i32
    return %c0_i32, %c0_i32_0 : i32, i32
  }
  func.func @transform_13(%arg0: i32) -> (i32, i32, i32) {
    %c0_i32 = arith.constant 0 : i32
    %c0_i32_0 = arith.constant 0 : i32
    %c0_i32_1 = arith.constant 0 : i32
    return %arg0, %c0_i32, %c0_i32_0 : i32, i32, i32
  }
}

</mosaic_0001>

<bundles_post_ra>
// kernel: apl_forward.1
= control target key start
LH: loop header
LB: loop body
LE: loop exit
PB: predicated region body
PF: predicated region fallthrough
CT: control target
= control target key end

     0   :  { %s2914_s25 = smov 0   ;;  %s3828_s0 = inlined_call_operand.vmem [shape: f32[2,102,66], index: 0, kind: input, shape index: {}]   ;;  %s3829_s1 = inlined_call_operand.vmem [shape: f32[2,32,3], index: 1, kind: input, shape index: {}]   ;;  %s3830_s2 = inlined_call_operand.vmem [shape: f32[80,1], index: 2, kind: input, shape index: {}]   ;;  %s3831_s3 = inlined_call_operand.vmem [shape: f32[32,32], index: 3, kind: input, shape index: {}]   ;;  %s3832_s4 = inlined_call_operand.vmem [shape: f32[3,32], index: 4, kind: input, shape index: {}]   ;;  %s3833_s5 = inlined_call_operand.vmem [shape: f32[1,32], index: 5, kind: input, shape index: {}]   ;;  %s3834_s6 = inlined_call_operand.vmem [shape: bf16[9,66,64], index: 6, kind: input, shape index: {}]   ;;  %s3835_s7 = inlined_call_operand.vmem [shape: f32[1,32], index: 7, kind: input, shape index: {}]   ;;  %s3836_s8 = inlined_call_operand.vmem [shape: bf16[64,32], index: 8, kind: input, shape index: {}]   ;;  %s3837_s9 = inlined_call_operand.vmem [shape: f32[1,32], index: 9, kind: input, shape index: {}]   ;;  %s3838_s10 = inlined_call_operand.vmem [shape: bf16[64,32], index: 10, kind: input, shape index: {}]   ;;  %s3839_s11 = inlined_call_operand.vmem [shape: f32[32,32], index: 11, kind: input, shape index: {}]   ;;  %s3840_s12 = inlined_call_operand.vmem [shape: f32[1,32], index: 12, kind: input, shape index: {}]   ;;  %s3841_s13 = inlined_call_operand.vmem [shape: f32[2,80,32], index: 13, kind: output, shape index: {}]  }
   0x1 LB: > { %s2375_s26 = sadd.s32 4294967295, %s2837_s25   ;;  %p2379_p0 = scmp.ge.s32.totalorder %s2837_s25, 1  ;;  %s2837_s25 = sphi %s2914_s25, %s23_s25  }
   0x2   : > { %p397_p1 = scmp.lt.s32.totalorder %s2837_s25, 3 }
   0x4   : > { %p398_p2 = pnand %p2379_p0, %p397_p1 }
   0x5   : > { %p446_p3 = scmp.lt.s32.totalorder (!%p398_p2), %s2375_s26, 1  ;;  %s2842_s16 = smov (!%p398_p2), 32  }
   0x6   : > { %401 = sbr.rel (%p398_p2) target bundleno = 1106 (0x452), region = 72 }
   0xb   : > { %s3843_s26 = smov (!%p446_p3, %s2375_s26), 1  ;;  %v466_v4 = vld [vmem:[%s3831_s3] sm:$0xff]  ;;  %vm470_vm0 = vcmask 261120   ;;  %v467_v5 = vld [vmem:[%s3831_s3 + $0x8] sm:$0xff]  ;;  %v468_v6 = vld [vmem:[%s3831_s3 + $0x10] sm:$0xff]  ;;  %vm530_vm1 = vcmask 1042432  }
   0xc   : > { %s2699_s27 = sshll.u32 %s3843_s26, 5  ;;  %v469_v7 = vld [vmem:[%s3831_s3 + $0x18] sm:$0xff]  ;;  %v512_v8 = vld [vmem:[%s3832_s4] sm:$0x7]  ;;  %v2402_v9 = vld [vmem:[%s3834_s6 + $0x44] sm:$0x1] }
   0xd   : > { %s455_s30 = scalar_lea.vmem %s3829_s1, %s2699_s27  ;;  %2388 = vmatpush.msk.msra.mxu1 %vm530_vm1, %v512_v8  ;;  %v681_v10 = vunpack.c.l.b16 %v2402_v9  ;;  %vm707_vm2 = vcmask 1040384   ;;  %vm517_vm3 = vcmask 23552   ;;  %v2707_v13 = vld [vmem:[%s3834_s6 + $0x3c] sm:$0xff]  ;;  %v2453_v15 = vld [vmem:[%s3834_s6 + $0x68] sm:$0x1]  ;;  %v2706_v16 = vld [vmem:[%s3834_s6 + $0x34] sm:$0xff] }
   0xe   : > { %v465_v0 = vld [vmem:[%s455_s30 + $0x18] sm:$0xff]  ;;  %v464_v1 = vld [vmem:[%s455_s30 + $0x10] sm:$0xff]  ;;  %v463_v2 = vld [vmem:[%s455_s30 + $0x8] sm:$0xff]  ;;  %v866_v17 = vunpack.c.l.b16 %v2453_v15  ;;  %s2753_s17 = smul.u32 104, %s3843_s26  ;;  %vm691_vm4 = vcmask 539648   ;;  %vm1737_vm6 = vcmask 523264  }
   0xf   : > { %495 = vmatpush.msra.mxu0 %v465_v0  ;;  %v462_v3 = vld [vmem:[%s455_s30] sm:$0xff]  ;;  %v686_v11 = vpack.c.b16 %v681_v10, %v681_v10  ;;  %v2705_v19 = vld [vmem:[%s3834_s6 + $0x2c] sm:$0xff]  ;;  %v2710_v32 = vld [vmem:[%s3834_s6 + $0x58] sm:$0xff]  ;;  %vm1797_vm7 = vcmask 540168  }
  0x10   : > { %v871_v18 = vpack.c.b16 %v866_v17, %v866_v17  ;;  %s2969_s22 = scalar_lea.vmem %s3828_s0, %s2753_s17  ;;  %v2704_v22 = vld [vmem:[%s3834_s6 + $0x24] sm:$0xff]  ;;  %v2709_v33 = vld [vmem:[%s3834_s6 + $0x50] sm:$0xff]  ;;  %v591_v44 = vld [vmem:[%s3839_s11 + $0x18] sm:$0xff]  ;;  %s2843_s17 = smov 96  }
  0x11   : > { %496 = vmatpush.msra.mxu0 %v464_v1  ;;  %v709_v12 = vsel %vm707_vm2, %v686_v11, 0  ;;  %v639_v23 = vld [vmem:[%s2969_s22 + $0x1] sm:$0xff]  ;;  %v640_v24 = vld [vmem:[%s2969_s22 + $0x9] sm:$0xff]  ;;  %v641_v28 = vld [vmem:[%s2969_s22 + $0x11] sm:$0xff]  ;;  %607 = vmatpush.msra.mxu2 %v591_v44 }
  0x12   : > { %714 = vmatpush.bf16.msra.mxu3 %v709_v12  ;;  %v892_v20 = vsel %vm707_vm2, %v871_v18, 0  ;;  %v649_v25 = vpack.c.bf16 %v640_v24, %v639_v23  ;;  %v642_v29 = vld [vmem:[%s2969_s22 + $0x19] sm:$0xff]  ;;  %v643_v34 = vld [vmem:[%s2969_s22 + $0x21] sm:$0xff]  ;;  %v644_v35 = vld [vmem:[%s2969_s22 + $0x29] sm:$0xff] }
  0x13   : > { %497 = vmatpush.msra.mxu0 %v463_v2  ;;  %2744 = vmatpush.bf16.msrb.mxu1 %v892_v20  ;;  %v650_v30 = vpack.c.bf16 %v642_v29, %v641_v28  ;;  %v2711_v31 = vld [vmem:[%s3834_s6 + $0x60] sm:$0xff]  ;;  %v651_v36 = vpack.c.bf16 %v644_v35, %v643_v34  ;;  %v2708_v37 = vld [vmem:[%s3834_s6 + $0x48] sm:$0xff]  ;;  %v645_v41 = vld [vmem:[%s2969_s22 + $0x31] sm:$0xff] }
  0x14   : > { %v824_v38 = vld [vmem:[%s2969_s22 + $0x2] sm:$0xff]  ;;  %v3000_v39 = vld [vmem:[%s2969_s22 + $0xa] sm:$0xff]  ;;  %v646_v42 = vld [vmem:[%s2969_s22 + $0x39] sm:$0xff] }
  0x15   : > { %498 = vmatpush.msra.mxu0 %v462_v3  ;;  %v834_v40 = vpack.c.bf16 %v3000_v39, %v824_v38  ;;  %v652_v43 = vpack.c.bf16 %v646_v42, %v645_v41  ;;  %v590_v45 = vld [vmem:[%s3839_s11 + $0x10] sm:$0xff]  ;;  %v3017_v47 = vld [vmem:[%s2969_s22 + $0x1a] sm:$0xff]  ;;  %v589_v50 = vld [vmem:[%s3839_s11 + $0x8] sm:$0xff] }
  0x16   : > { %2384 = vmatmul.msk.f32.vlgmr.msra.gmra.mxu0 %vm470_vm0, %v466_v4  ;;  %715 = vmatpush.bf16.msra.mxu3 %v2707_v13  ;;  %v3014_v46 = vld [vmem:[%s2969_s22 + $0x12] sm:$0xff]  ;;  %v638_v49 = vld [vmem:[%s3834_s6 + $0x20] sm:$0x1]  ;;  %v2513_v56 = vld [vmem:[%s3834_s6 + $0xb0] sm:$0x1] }
  0x17   : > { %897 = vmatpush.bf16.msrb.mxu0 %v892_v20  ;;  %2745 = vmatpush.bf16.msrb.mxu1 %v2711_v31  ;;  %v835_v48 = vpack.c.bf16 %v3017_v47, %v3014_v46  ;;  %v762_v51 = vunpack.c.l.b16 %v638_v49  ;;  %v588_v53 = vld [vmem:[%s3839_s11] sm:$0xff]  ;;  %v2703_v57 = vld [vmem:[%s3834_s6 + $0x18] sm:$0xff]  ;;  %v1094_v58 = vunpack.c.l.b16 %v2513_v56  ;;  %v648_v60 = vld [vmem:[%s2969_s22 + $0x49] sm:$0xff] }
  0x18   : > { %608 = vmatpush.msra.mxu2 %v590_v45  ;;  %v647_v59 = vld [vmem:[%s2969_s22 + $0x41] sm:$0xff]  ;;  %v2483_v61 = vld [vmem:[%s3834_s6 + $0x8c] sm:$0x1]  ;;  %v2702_v2 = vld [vmem:[%s3834_s6 + $0x10] sm:$0xff]  ;;  %v948_v45 = vpack.c.bf16 %v3014_v46, %v3000_v39 }
  0x19   : > { %v767_v54 = vpack.c.b16 %v762_v51, %v762_v51  ;;  %v1099_v62 = vpack.c.b16 %v1094_v58, %v1094_v58  ;;  %v980_v63 = vunpack.c.l.b16 %v2483_v61  ;;  %v653_v3 = vpack.c.bf16 %v648_v60, %v647_v59  ;;  %v2701_v8 = vld [vmem:[%s3834_s6 + $0x8] sm:$0xff]  ;;  %v2718_v13 = vld [vmem:[%s3834_s6 + $0xa0] sm:$0xff]  ;;  %v3122_v39 = vld [vmem:[%s2969_s22 + $0x33] sm:$0xff] }
  0x1a   : > { %716 = vmatpush.bf16.msra.mxu3 %v2706_v16  ;;  %609 = vmatpush.msra.mxu2 %v589_v50  ;;  %v3059_v9 = vld [vmem:[%s2969_s22 + $0x22] sm:$0xff]  ;;  %v3062_v10 = vld [vmem:[%s2969_s22 + $0x2a] sm:$0xff]  ;;  %v2839_v16 = vmov 32.0  }
  0x1b   : > { %898 = vmatpush.bf16.msrb.mxu0 %v2711_v31  ;;  %2746 = vmatpush.bf16.msrb.mxu1 %v2710_v32  ;;  %v788_v55 = vsel %vm707_vm2, %v767_v54, 0  ;;  %v1120_v1 = vsel %vm707_vm2, %v1099_v62, 0  ;;  %v985_v4 = vpack.c.b16 %v980_v63, %v980_v63  ;;  %v836_v11 = vpack.c.bf16 %v3062_v10, %v3059_v9  ;;  %v2715_v12 = vld [vmem:[%s3834_s6 + $0x84] sm:$0xff]  ;;  %v2714_v20 = vld [vmem:[%s3834_s6 + $0x7c] sm:$0xff]  ;;  %v2712_v41 = vld [vmem:[%s3834_s6 + $0x6c] sm:$0xff] }
  0x1c   : > { %610 = vmatpush.msra.mxu2 %v588_v53  ;;  %2805 = vrcp.f32 %v2839_v16  ;;  %v2700_v17 = vld [vmem:[%s3834_s6] sm:$0xff]  ;;  %v3090_v29 = vld [vmem:[%s2969_s22 + $0xb] sm:$0xff]  ;;  %v2840_v31 = vmov 65   ;;  %v2543_v53 = vld [vmem:[%s3834_s6 + $0xd4] sm:$0x1] }
  0x1d   : > { %2769 = vset.pattern.permute.xlu1 %v2840_v31  ;;  %2768 = vset.pattern.permute.xlu0 %v2840_v31  ;;  %v3100_v34 = vld [vmem:[%s2969_s22 + $0x2b] sm:$0xff]  ;;  %v3103_v35 = vld [vmem:[%s2969_s22 + $0x1b] sm:$0xff]  ;;  %v1208_v56 = vunpack.c.l.b16 %v2543_v53  ;;  %v3125_v46 = vld [vmem:[%s2969_s22 + $0x23] sm:$0xff] }
  0x1e   : > { %2385 = vmatmul.msk.f32.gmra.mxu0 %vm470_vm0, %v467_v5  ;;  %717 = vmatpush.bf16.msra.mxu3 %v2705_v19  ;;  %v2719_v5 = vld [vmem:[%s3834_s6 + $0xa8] sm:$0xff]  ;;  %v1063_v61 = vpack.c.bf16 %v3125_v46, %v3103_v35  ;;  %v2603_v53 = vld [vmem:[%s3834_s6 + $0x11c] sm:$0x1] }
  0x1f   : > { %899 = vmatpush.bf16.msrb.mxu0 %v2710_v32  ;;  %2747 = vmatpush.bf16.msrb.mxu1 %v2709_v33  ;;  %v1213_v60 = vpack.c.b16 %v1208_v56, %v1208_v56 }
  0x20   : > { %793 = vmatpush.bf16.msrb.mxu2 %v788_v55  ;;  %2770 = vset.pattern.permute.xlu2 %v2840_v31 }
  0x21   : > { %1658 = vperm.xlu1 %2769, %v3100_v34   ;;  %1648 = vperm.xlu0 %2768, %v3103_v35  }
  0x22   : > { %718 = vmatpush.bf16.msra.mxu3 %v2704_v22 }
  0x23   : > { %900 = vmatpush.bf16.msrb.mxu0 %v2709_v33  ;;  %2748 = vmatpush.bf16.msrb.mxu1 %v2708_v37 }
  0x24   : > { %794 = vmatpush.bf16.msrb.mxu2 %v2703_v57 }
  0x25   : > { %2419 = vmatmul.msk.bf16.vlgmr.msra.gmra.mxu3 %vm691_vm4, %v649_v25  ;;  %v2806_v25 = vpop.eup %2805 }
  0x26   : > { %2386 = vmatmul.msk.f32.gmra.mxu0 %vm470_vm0, %v468_v6  ;;  %1125 = vmatpush.bf16.msrb.mxu3 %v1120_v1  ;;  %v1006_v6 = vsel %vm707_vm2, %v985_v4, 0  ;;  %vm585_vm5 = vweird.f32 %v2806_v25  ;;  %v1234_v1 = vsel %vm707_vm2, %v1213_v60, 0  ;;  %v616_v4 = vld [vmem:[%s2969_s22 + $0x8] sm:$0xff] }
  0x27   : > { %901 = vmatpush.bf16.msrb.mxu0 %v2708_v37 }
  0x28   : > { %795 = vmatpush.bf16.msrb.mxu2 %v2702_v2  ;;  %v949_v2 = vpack.c.bf16 %v3059_v9, %v3017_v47  ;;  %v830_v47 = vld [vmem:[%s2969_s22 + $0x32] sm:$0xff]  ;;  %v2722_v9 = vld [vmem:[%s3834_s6 + $0xc4] sm:$0xff] }
  0x29   : > { %1663 = vperm.xlu1 %2769, %v3122_v39   ;;  %1653 = vperm.xlu0 %2768, %v3125_v46  }
  0x2a   : > { %1126 = vmatpush.bf16.msrb.mxu3 %v2719_v5  ;;  %v2723_v5 = vld [vmem:[%s3834_s6 + $0xcc] sm:$0xff] }
  0x2b   : > { %1011 = vmatpush.bf16.msra.mxu0 %v1006_v6 }
  0x2c   : > { %796 = vmatpush.bf16.msrb.mxu2 %v2701_v8 }
  0x2e   : > { %2387 = vmatmul.msk.f32.gmra.mxu0 %vm470_vm0, %v469_v7  ;;  %v2801_v7 = vld [vmem:[%s3833_s5] ss:$0 sm:$0xff]  ;;  %1127 = vmatpush.bf16.msrb.mxu3 %v2718_v13  ;;  %v2573_v13 = vld [vmem:[%s3834_s6 + $0xf8] sm:$0x1] }
  0x2f   : > { %1012 = vmatpush.bf16.msra.mxu0 %v2715_v12  ;;  %v3155_v12 = vld [vmem:[%s2969_s22 + $0x3b] sm:$0xff] }
  0x30   : > { %797 = vmatpush.bf16.msrb.mxu2 %v2700_v17  ;;  %1668 = vperm.xlu2 %2770, %v3155_v12   ;;  %v950_v17 = vpack.c.bf16 %v830_v47, %v3062_v10  ;;  %v2721_v10 = vld [vmem:[%s3834_s6 + $0xbc] sm:$0xff] }
  0x31   : > { %1638 = vperm.xlu0 %2768, %v3090_v29  }
  0x33   : > { %1013 = vmatpush.bf16.msra.mxu0 %v2714_v20  ;;  %v618_v20 = vld [vmem:[%s2969_s22 + $0x18] sm:$0xff] }
  0x35   : > { %2420 = vmatmul.msk.bf16.gmra.mxu3 %vm691_vm4, %v650_v30  ;;  %v3093_v30 = vld [vmem:[%s2969_s22 + $0x13] sm:$0xff] }
  0x36   : > { %2470 = vmatmul.msk.bf16.vlgmr.msrb.gmra.mxu0 %vm691_vm4, %v834_v40  ;;  %v1062_v33 = vpack.c.bf16 %v3093_v30, %v3090_v29  ;;  %v581_v40 = vmul.f32 32.0, %v2806_v25  ;;  %1643 = vperm.xlu1 %2769, %v3093_v30  }
  0x38   : > { %v582_v49 = vsub.f32 1.0, %v581_v40  ;;  %v620_v40 = vld [vmem:[%s2969_s22 + $0x28] sm:$0xff] }
  0x45   : > { %2421 = vmatmul.msk.bf16.gmra.mxu3 %vm691_vm4, %v651_v36 }
  0x46   : > { %2471 = vmatmul.msk.bf16.gmra.mxu0 %vm691_vm4, %v835_v48 }
  0x55   : > { %2422 = vmatmul.msk.bf16.gmra.mxu3 %vm691_vm4, %v652_v43 }
  0x56   : > { %2472 = vmatmul.msk.bf16.gmra.mxu0 %vm691_vm4, %v836_v11  ;;  %v3152_v11 = vld [vmem:[%s2969_s22 + $0x53] sm:$0xff] }
  0x57   : > { %1683 = vperm.xlu0 %2768, %v3152_v11  }
  0x65   : > { %2423 = vmatmul.msk.bf16.gmra.mxu3 %vm691_vm4, %v653_v3  ;;  %v615_v3 = vld [vmem:[%s2969_s22] sm:$0xff] }
  0x66   : > { %v625_v6 = vpack.c.bf16 %v616_v4, %v615_v3  ;;  %v2730_v3 = vld [vmem:[%s3834_s6 + $0x10c] sm:$0xff] }
  0x67   : > { %v2733_v4 = vld [vmem:[%s3834_s6 + $0x128] sm:$0xff] }
  0x93   : > { %v500_v14 = vpop.f32.mrf.mxu0 }
  0x94   : > { %2389 = vmatmul.msk.f32.vlgmr.msra.gmra.mxu1 %vm517_vm3, %v500_v14 }
  0x9b   : > { %v503_v21 = vpop.f32.mrf.mxu0 }
  0x9c   : > { %2390 = vmatmul.msk.f32.gmra.mxu1 %vm517_vm3, %v503_v21  ;;  %v2717_v21 = vld [vmem:[%s3834_s6 + $0x98] sm:$0xff] }
  0x9d   : > { %1128 = vmatpush.bf16.msrb.mxu3 %v2717_v21 }
  0xa3   : > { %v506_v26 = vpop.f32.mrf.mxu0 }
  0xa4   : > { %2391 = vmatmul.msk.f32.gmra.mxu1 %vm517_vm3, %v506_v26  ;;  %v2713_v26 = vld [vmem:[%s3834_s6 + $0x74] sm:$0xff] }
  0xa5   : > { %1014 = vmatpush.bf16.msra.mxu0 %v2713_v26  ;;  %v3181_v26 = vld [vmem:[%s2969_s22 + $0x43] sm:$0xff] }
  0xa6   : > { %1673 = vperm.xlu2 %2770, %v3181_v26  }
  0xa9   : > { %1015 = vmatpush.bf16.msra.mxu0 %v2712_v41  ;;  %v2724_v41 = vld [vmem:[%s3834_s6 + $0xd8] sm:$0xff] }
  0xab   : > { %v509_v27 = vpop.f32.mrf.mxu0 }
  0xac   : > { %2392 = vmatmul.msk.f32.gmra.mxu1 %vm517_vm3, %v509_v27  ;;  %v2716_v27 = vld [vmem:[%s3834_s6 + $0x90] sm:$0xff]  ;;  %2500 = vmatmul.msk.bf16.vlgmr.msra.gmra.mxu0 %vm691_vm4, %v948_v45  ;;  %v2633_v45 = vld [vmem:[%s3834_s6 + $0x140] sm:$0x1] }
  0xad   : > { %1129 = vmatpush.bf16.msrb.mxu3 %v2716_v27  ;;  %v2726_v27 = vld [vmem:[%s3834_s6 + $0xe8] sm:$0xff] }
  0xb0   : > { %2530 = vmatmul.msk.bf16.vlgmr.msrb.gmra.mxu3 %vm691_vm4, %v1062_v33  ;;  %v3194_v33 = vld [vmem:[%s2969_s22 + $0x4b] sm:$0xff] }
  0xb1   : > { %1678 = vperm.xlu2 %2770, %v3194_v33   ;;  %v1066_v56 = vpack.c.bf16 %v3152_v11, %v3194_v33 }
  0xbc   : > { %2501 = vmatmul.msk.bf16.gmra.mxu0 %vm691_vm4, %v949_v2  ;;  %v622_v2 = vld [vmem:[%s2969_s22 + $0x38] sm:$0xff] }
  0xc0   : > { %2531 = vmatmul.msk.bf16.gmra.mxu3 %vm691_vm4, %v1063_v61 }
  0xcc   : > { %2502 = vmatmul.msk.bf16.gmra.mxu0 %vm691_vm4, %v950_v17 }
 0x111   : > { %v551_v52 = vpop.f32.mrf.mxu1 }
 0x112   : > { %v552_v18 = vadd.f32 %v2801_v7, %v551_v52  ;;  %v583_v52 = vmul.f32 %v2806_v25, %v582_v49  ;;  %v1550_v49 = vunpack.c.l.b16 %v2633_v45 }
 0x114   : > { %v563_v23 = vmax.f32 %v552_v18, 0.0  ;;  %v584_v57 = vadd.f32 %v2806_v25, %v583_v52  ;;  %v1555_v52 = vpack.c.b16 %v1550_v49, %v1550_v49  ;;  %v1397_v49 = vld [vmem:[%s2969_s22 + $0x2d] sm:$0xff] }
 0x116   : > { %v567_v36 = vsel %vm470_vm0, %v563_v23, 0.0  ;;  %v586_v62 = vsel %vm585_vm5, %v2806_v25, %v584_v57  ;;  %v833_v23 = vld [vmem:[%s2969_s22 + $0x4a] sm:$0xff] }
 0x117   : > { %v2727_v25 = vld [vmem:[%s3834_s6 + $0xf0] sm:$0xff] }
 0x119   : > { %v554_v0 = vpop.f32.mrf.mxu1 }
 0x11a   : > { %v555_v14 = vadd.f32 %v2801_v7, %v554_v0 }
 0x11c   : > { %v564_v22 = vmax.f32 %v555_v14, 0.0  ;;  %v1064_v14 = vpack.c.bf16 %v3122_v39, %v3100_v34 }
 0x11e   : > { %v568_v28 = vsel %vm470_vm0, %v564_v22, 0.0  ;;  %2532 = vmatmul.msk.bf16.gmra.mxu3 %vm691_vm4, %v1064_v14  ;;  %v832_v22 = vld [vmem:[%s2969_s22 + $0x42] sm:$0xff] }
 0x11f   : > { %v569_v42 = vadd.f32 %v568_v28, %v567_v36  ;;  %v1065_v28 = vpack.c.bf16 %v3181_v26, %v3155_v12  ;;  %v3196_v36 = vpop.f32.mrf.mxu3  ;;  %v2732_v14 = vld [vmem:[%s3834_s6 + $0x120] sm:$0xff] }
 0x121   : > { %v557_v15 = vpop.f32.mrf.mxu1 }
 0x122   : > { %v558_v19 = vadd.f32 %v2801_v7, %v557_v15  ;;  %v1322_v15 = vunpack.c.l.b16 %v2573_v13  ;;  %v2729_v13 = vld [vmem:[%s3834_s6 + $0x104] sm:$0xff] }
 0x124   : > { %v565_v24 = vmax.f32 %v558_v19, 0.0  ;;  %v1327_v16 = vpack.c.b16 %v1322_v15, %v1322_v15  ;;  %v617_v19 = vld [vmem:[%s2969_s22 + $0x10] sm:$0xff] }
 0x125   : > { %v626_v21 = vpack.c.bf16 %v618_v20, %v617_v19  ;;  %v1508_v15 = vld [vmem:[%s2969_s22 + $0x16] sm:$0xff] }
 0x126   : > { %v570_v37 = vsel %vm470_vm0, %v565_v24, 0.0  ;;  %v1348_v18 = vsel %vm707_vm2, %v1327_v16, 0  ;;  %v838_v24 = vpack.c.bf16 %v833_v23, %v832_v22  ;;  %v1509_v16 = vld [vmem:[%s2969_s22 + $0x1e] sm:$0xff]  ;;  %v1394_v19 = vld [vmem:[%s2969_s22 + $0x15] sm:$0xff] }
 0x127   : > { %v571_v44 = vadd.f32 %v570_v37, %v569_v42  ;;  %1353 = vmatpush.bf16.msra.mxu1 %v1348_v18  ;;  %v1518_v17 = vpack.c.bf16 %v1509_v16, %v1508_v15  ;;  %v2728_v18 = vld [vmem:[%s3834_s6 + $0xfc] sm:$0xff] }
 0x128   : > { %v1395_v20 = vld [vmem:[%s2969_s22 + $0x1d] sm:$0xff] }
 0x129   : > { %v560_v32 = vpop.f32.mrf.mxu1 }
 0x12a   : > { %v561_v38 = vadd.f32 %v2801_v7, %v560_v32  ;;  %v831_v7 = vld [vmem:[%s2969_s22 + $0x3a] sm:$0xff] }
 0x12b   : > { %v837_v8 = vpack.c.bf16 %v831_v7, %v830_v47  ;;  %1354 = vmatpush.bf16.msra.mxu1 %v2727_v25  ;;  %v2725_v32 = vld [vmem:[%s3834_s6 + $0xe0] sm:$0xff]  ;;  %v951_v37 = vpack.c.bf16 %v832_v22, %v831_v7  ;;  %v3256_v47 = vld [vmem:[%s2969_s22 + $0x2c] sm:$0xff]  ;;  %v3281_v22 = vpop.f32.mrf.mxu0 }
 0x12c   : > { %v566_v43 = vmax.f32 %v561_v38, 0.0  ;;  %v619_v38 = vld [vmem:[%s2969_s22 + $0x20] sm:$0xff] }
 0x12d   : > { %2473 = vmatmul.msk.bf16.vlgmr.msrb.gmra.mxu1 %vm691_vm4, %v837_v8  ;;  %2503 = vmatmul.msk.bf16.gmra.mxu0 %vm691_vm4, %v951_v37  ;;  %v627_v42 = vpack.c.bf16 %v620_v40, %v619_v38  ;;  %v2739_v8 = vld [vmem:[%s3836_s8 + $0x18] sm:$0xff]  ;;  %v2738_v38 = vld [vmem:[%s3836_s8 + $0x10] sm:$0xff]  ;;  %v1510_v40 = vld [vmem:[%s2969_s22 + $0x26] sm:$0xff] }
 0x12e   : > { %v572_v48 = vsel %vm470_vm0, %v566_v43, 0.0  ;;  %2533 = vmatmul.msk.bf16.gmra.mxu3 %vm691_vm4, %v1065_v28  ;;  %v3206_v43 = vld [vmem:[%s2969_s22 + $0x14] sm:$0xff]  ;;  %v3292_v28 = vld [vmem:[%s2969_s22 + $0x3c] sm:$0xff] }
 0x12f   : > { %v573_v50 = vadd.f32 %v572_v48, %v571_v44  ;;  %1355 = vmatpush.bf16.msra.mxu1 %v2726_v27  ;;  %v3209_v44 = vld [vmem:[%s2969_s22 + $0x1c] sm:$0xff]  ;;  %v3289_v27 = vld [vmem:[%s2969_s22 + $0x34] sm:$0xff] }
 0x130   : > { %v1290_v48 = vpack.c.bf16 %v3209_v44, %v3206_v43 }
 0x131   : > { %v574_v51 = vrot.slane %v573_v50, 4 }
 0x133   : > { %v575_v54 = vadd.f32 %v574_v51, %v573_v50  ;;  %1356 = vmatpush.bf16.msra.mxu1 %v2725_v32  ;;  %v2720_v50 = vld [vmem:[%s3834_s6 + $0xb4] sm:$0xff]  ;;  %v3221_v51 = vpop.f32.mrf.mxu3  ;;  %v1292_v32 = vpack.c.bf16 %v3292_v28, %v3289_v27  ;;  %v3296_v37 = vpop.f32.mrf.mxu0 }
 0x135   : > { %v576_v55 = vrot.slane %v575_v54, 2 }
 0x137   : > { %v577_v58 = vadd.f32 %v576_v55, %v575_v54  ;;  %1357 = vmatpush.bf16.msra.mxu1 %v2724_v41  ;;  %v1436_v54 = vunpack.c.l.b16 %v2603_v53  ;;  %v1576_v55 = vsel %vm707_vm2, %v1555_v52, 0  ;;  %v1511_v41 = vld [vmem:[%s2969_s22 + $0x2e] sm:$0xff] }
 0x138   : > { %1581 = vmatpush.bf16.msra.mxu3 %v1576_v55  ;;  %v1519_v45 = vpack.c.bf16 %v1511_v41, %v1510_v40  ;;  %v1166_v52 = vld [vmem:[%s2969_s22 + $0xc] sm:$0xff] }
 0x139   : > { %v578_v59 = vrot.slane %v577_v58, 1  ;;  %v1441_v57 = vpack.c.b16 %v1436_v54, %v1436_v54  ;;  %v1176_v55 = vpack.c.bf16 %v3206_v43, %v1166_v52 }
 0x13b   : > { %v579_v63 = vadd.f32 %v578_v59, %v577_v58  ;;  %v2735_v58 = vld [vmem:[%s3834_s6 + $0x138] sm:$0xff]  ;;  %v1462_v60 = vsel %vm707_vm2, %v1441_v57, 0  ;;  %1757 = vmatpush.bf16.msrb.mxu1 %v2739_v8  ;;  %v3311_v53 = vpop.f32.mrf.mxu0  ;;  %v3321_v57 = vld [vmem:[%s2969_s22 + $0x4c] sm:$0xff] }
 0x13c   : > { %v947_v59 = vld [vmem:[%s2969_s22 + $0x52] sm:$0xff]  ;;  %1467 = vmatpush.bf16.msrb.mxu0 %v1462_v60  ;;  %1582 = vmatpush.bf16.msra.mxu3 %v2735_v58  ;;  %v1513_v60 = vld [vmem:[%s2969_s22 + $0x3e] sm:$0xff] }
 0x13d   : > { %v587_v0 = vmul.f32 %v586_v62, %v579_v63  ;;  %2474 = vmatmul.msk.bf16.gmra.mxu1 %vm691_vm4, %v838_v24  ;;  %v952_v61 = vpack.c.bf16 %v947_v59, %v833_v23  ;;  %v2731_v62 = vld [vmem:[%s3834_s6 + $0x114] sm:$0xff]  ;;  %v623_v23 = vld [vmem:[%s2969_s22 + $0x40] sm:$0xff]  ;;  %v624_v24 = vld [vmem:[%s2969_s22 + $0x48] sm:$0xff] }
 0x13e   : > { %2534 = vmatmul.msk.bf16.gmra.mxu3 %vm691_vm4, %v1066_v56  ;;  %v2734_v63 = vld [vmem:[%s3834_s6 + $0x130] sm:$0xff]  ;;  %v3318_v56 = vld [vmem:[%s2969_s22 + $0x44] sm:$0xff] }
 0x13f   : > { %2393 = vmatmul.msk.f32.vlgmr.msra.gmra.mxu2 %vm470_vm0, %v587_v0  ;;  %v3241_v0 = vpop.f32.mrf.mxu3  ;;  %2504 = vmatmul.msk.bf16.gmra.mxu0 %vm691_vm4, %v952_v61  ;;  %v1293_v58 = vpack.c.bf16 %v3321_v57, %v3318_v56  ;;  %v1512_v59 = vld [vmem:[%s2969_s22 + $0x36] sm:$0xff]  ;;  %v2737_v61 = vld [vmem:[%s3836_s8 + $0x8] sm:$0xff] }
 0x140   : > { %1239 = vmatpush.bf16.msra.mxu2 %v1234_v1  ;;  %v621_v1 = vld [vmem:[%s2969_s22 + $0x30] sm:$0xff]  ;;  %1468 = vmatpush.bf16.msrb.mxu0 %v2731_v62  ;;  %v1520_v43 = vpack.c.bf16 %v1513_v60, %v1512_v59 }
 0x141   : > { %1583 = vmatpush.bf16.msra.mxu3 %v2734_v63  ;;  %1758 = vmatpush.bf16.msrb.mxu1 %v2738_v38  ;;  %v1398_v63 = vld [vmem:[%s2969_s22 + $0x35] sm:$0xff] }
 0x142   : > { %v1516_v60 = vld [vmem:[%s2969_s22 + $0x56] sm:$0xff] }
 0x143   : > { %v3332_v62 = vpop.f32.mrf.mxu0 }
 0x144   : > { %1240 = vmatpush.bf16.msra.mxu2 %v2723_v5  ;;  %v628_v5 = vpack.c.bf16 %v622_v2, %v621_v1  ;;  %1469 = vmatpush.bf16.msrb.mxu0 %v2730_v3  ;;  %v1399_v1 = vld [vmem:[%s2969_s22 + $0x3d] sm:$0xff] }
 0x145   : > { %1584 = vmatpush.bf16.msra.mxu3 %v2733_v4  ;;  %1759 = vmatpush.bf16.msrb.mxu1 %v2737_v61  ;;  %v1406_v3 = vpack.c.bf16 %v1399_v1, %v1398_v63  ;;  %v1659_v4 = vpop.permute.xlu1 %1658  ;;  %v1402_v63 = vld [vmem:[%s2969_s22 + $0x55] sm:$0xff]  ;;  %v1403_v1 = vld [vmem:[%s2969_s22 + $0x5d] sm:$0xff] }
 0x147   : > { %2440 = vmatmul.msk.bf16.vlgmr.msrb.gmra.mxu2 %vm691_vm4, %v625_v6  ;;  %v3253_v6 = vld [vmem:[%s2969_s22 + $0x24] sm:$0xff] }
 0x148   : > { %1241 = vmatpush.bf16.msra.mxu2 %v2722_v9  ;;  %v1291_v7 = vpack.c.bf16 %v3256_v47, %v3253_v6  ;;  %v3265_v9 = vpop.f32.mrf.mxu3  ;;  %1470 = vmatpush.bf16.msrb.mxu0 %v2729_v13  ;;  %v3347_v13 = vld [vmem:[%s2969_s22 + $0x54] sm:$0xff] }
 0x149   : > { %1585 = vmatpush.bf16.msra.mxu3 %v2732_v14  ;;  %v1289_v14 = vld [vmem:[%s2969_s22 + $0x5c] sm:$0xff] }
 0x14a   : > { %v1294_v15 = vpack.c.bf16 %v1289_v14, %v3347_v13 }
 0x14c   : > { %1242 = vmatpush.bf16.msra.mxu2 %v2721_v10  ;;  %1471 = vmatpush.bf16.msrb.mxu0 %v2728_v18  ;;  %v629_v10 = vpack.c.bf16 %v624_v24, %v623_v23 }
 0x14d   : > { %2590 = vmatmul.msk.bf16.vlgmr.msra.gmra.mxu1 %vm691_vm4, %v1290_v48  ;;  %v1396_v48 = vld [vmem:[%s2969_s22 + $0x25] sm:$0xff]  ;;  %v1664_v18 = vpop.permute.xlu1 %1663 }
 0x14e   : > { %2650 = vmatmul.msk.bf16.vlgmr.msra.gmra.mxu3 %vm691_vm4, %v1518_v17  ;;  %v3356_v17 = vmul.f32 %v1659_v4, %v3100_v34  ;;  %v1408_v4 = vpack.c.bf16 %v1403_v1, %v1402_v63 }
 0x150   : > { %1243 = vmatpush.bf16.msra.mxu2 %v2720_v50  ;;  %v3285_v25 = vpop.f32.mrf.mxu3  ;;  %v1405_v50 = vpack.c.bf16 %v1397_v49, %v1396_v48  ;;  %v1178_v48 = vpack.c.bf16 %v3289_v27, %v3256_v47  ;;  %v1787_v47 = vld [vmem:[%s3830_s2] sm:$0xff] }
 0x151   : > { %vm1916_vm8 = vcmp.gt.f32.partialorder %v1787_v47, 0.0 }
 0x154   : > { %2749 = vmatpush.bf16.msrb.mxu2 %v2739_v8  ;;  %v3344_v8 = vpop.f32.mrf.mxu0 }
 0x155   : > { %v1644_v41 = vpop.permute.xlu1 %1643 }
 0x156   : > { %v1687_v49 = vmul.f32 %v1644_v41, %v3093_v30 }
 0x157   : > { %2441 = vmatmul.msk.bf16.gmra.mxu2 %vm691_vm4, %v626_v21  ;;  %v1404_v21 = vpack.c.bf16 %v1395_v20, %v1394_v19  ;;  %v1515_v19 = vld [vmem:[%s2969_s22 + $0x4e] sm:$0xff]  ;;  %v3363_v20 = vmul.f32 %v1664_v18, %v3122_v39 }
 0x158   : > { %2750 = vmatpush.bf16.msrb.mxu2 %v2738_v38 }
 0x159   : > { %2620 = vmatmul.msk.bf16.vlgmr.msrb.gmra.mxu0 %vm691_vm4, %v1404_v21  ;;  %v1698_v23 = vpack.c.bf16 %v3363_v20, %v3356_v17 }
 0x15c   : > { %2751 = vmatpush.bf16.msrb.mxu2 %v2737_v61  ;;  %v3368_v24 = vpop.f32.mrf.mxu0  ;;  %v1517_v61 = vld [vmem:[%s2969_s22 + $0x5e] sm:$0xff] }
 0x15d   : > { %2591 = vmatmul.msk.bf16.gmra.mxu1 %vm691_vm4, %v1291_v7  ;;  %v1177_v7 = vpack.c.bf16 %v3253_v6, %v3209_v44  ;;  %v1514_v6 = vld [vmem:[%s2969_s22 + $0x46] sm:$0xff] }
 0x15e   : > { %2651 = vmatmul.msk.bf16.gmra.mxu3 %vm691_vm4, %v1519_v45  ;;  %v1521_v21 = vpack.c.bf16 %v1515_v19, %v1514_v6  ;;  %v2736_v45 = vld [vmem:[%s3836_s8] sm:$0xff]  ;;  %v3410_v6 = vld [vmem:[%s3830_s2 + $0x28] sm:$0xff]  ;;  %v1798_v19 = vsel %vm1797_vm7, %v3090_v29, 0.0 }
 0x15f   : > { %1760 = vmatpush.bf16.msrb.mxu1 %v2736_v45  ;;  %vm1921_vm13 = vcmp.gt.f32.partialorder %v3410_v6, 0.0 }
 0x160   : > { %2752 = vmatpush.bf16.msrb.mxu2 %v2736_v45 }
 0x164   : > { %v1017_v27 = vpop.f32.mrf.mxu0 }
 0x167   : > { %2442 = vmatmul.msk.bf16.gmra.mxu2 %vm691_vm4, %v627_v42  ;;  %v3305_v42 = vpop.f32.mrf.mxu3 }
 0x169   : > { %2621 = vmatmul.msk.bf16.gmra.mxu0 %vm691_vm4, %v1405_v50 }
 0x16c   : > { %v1019_v14 = vpop.f32.mrf.mxu0 }
 0x16d   : > { %2592 = vmatmul.msk.bf16.gmra.mxu1 %vm691_vm4, %v1292_v32  ;;  %v1401_v32 = vld [vmem:[%s2969_s22 + $0x4d] sm:$0xff] }
 0x16e   : > { %2652 = vmatmul.msk.bf16.gmra.mxu3 %vm691_vm4, %v1520_v43  ;;  %v1522_v43 = vpack.c.bf16 %v1517_v61, %v1516_v60  ;;  %v1805_v60 = vsel %vm1797_vm7, %v3100_v34, 0.0  ;;  %v1807_v34 = vsel %vm1797_vm7, %v3122_v39, 0.0 }
 0x16f   : > { %v3314_v54 = vpop.f32.mrf.mxu3 }
 0x177   : > { %2443 = vmatmul.msk.bf16.gmra.mxu2 %vm691_vm4, %v628_v5  ;;  %v3336_v2 = vpop.f32.mrf.mxu3  ;;  %v3340_v5 = vpop.permute.xlu0 %1648 }
 0x179   : > { %2622 = vmatmul.msk.bf16.gmra.mxu0 %vm691_vm4, %v1406_v3  ;;  %v3398_v3 = vld [vmem:[%s3830_s2 + $0x18] sm:$0xff] }
 0x17a   : > { %vm1919_vm10 = vcmp.gt.f32.partialorder %v3398_v3, 0.0 }
 0x17d   : > { %2593 = vmatmul.msk.bf16.gmra.mxu1 %vm691_vm4, %v1293_v58  ;;  %v2841_v58 = vmov 0  }
 0x17e   : > { %2653 = vmatmul.msk.bf16.gmra.mxu3 %vm691_vm4, %v1521_v21  ;;  %2771 = vset.pattern.permute.xlu1 %v2841_v58  ;;  %v1799_v21 = vsel %vm1797_vm7, %v3093_v30, 0.0 }
 0x17f   : > { %v3351_v16 = vpop.f32.mrf.mxu3  ;;  %v3358_v44 = vpop.permute.xlu0 %1653  ;;  %1826 = vperm.xlu1 %2771, %v1787_v47   ;;  %2772 = vset.pattern.permute.xlu2 %v2841_v58 }
 0x180   : > { %2773 = vset.pattern.permute.xlu0 %v2841_v58 }
 0x187   : > { %2444 = vmatmul.msk.bf16.gmra.mxu2 %vm691_vm4, %v629_v10  ;;  %v1400_v10 = vld [vmem:[%s2969_s22 + $0x45] sm:$0xff]  ;;  %v3372_v40 = vpop.f32.mrf.mxu3  ;;  %v1639_v50 = vpop.permute.xlu0 %1638  ;;  %1841 = vperm.xlu1 %2771, %v3398_v3   ;;  %s2754_s22 = smul.u32 80, %s3843_s26 }
 0x188   : > { %v1407_v38 = vpack.c.bf16 %v1401_v32, %v1400_v10  ;;  %v1686_v52 = vmul.f32 %v1639_v50, %v3090_v29  ;;  %v1022_v32 = vpop.f32.mrf.mxu0  ;;  %v3429_v29 = vld [vmem:[%s3830_s2 + $0x40] sm:$0xff] }
 0x189   : > { %vm1924_vm15 = vcmp.gt.f32.partialorder %v3429_v29, 0.0 }
 0x18a   : > { %2623 = vmatmul.msk.bf16.gmra.mxu0 %vm691_vm4, %v1407_v38  ;;  %v1801_v38 = vsel %vm1797_vm7, %v3103_v35, 0.0 }
 0x18d   : > { %2594 = vmatmul.msk.bf16.gmra.mxu1 %vm691_vm4, %v1294_v15  ;;  %v1179_v15 = vpack.c.bf16 %v3318_v56, %v3292_v28  ;;  %v1800_v56 = vadd.f32 %v1799_v21, %v1798_v19 }
 0x18e   : > { %2654 = vmatmul.msk.bf16.gmra.mxu3 %vm691_vm4, %v1522_v43 }
 0x18f   : > { %v1131_v59 = vpop.f32.mrf.mxu3  ;;  %1851 = vperm.xlu1 %2771, %v3410_v6   ;;  %v1802_v30 = vadd.f32 %v1801_v38, %v1800_v56  ;;  %v1689_v56 = vmul.f32 %v3358_v44, %v3125_v46 }
 0x190   : > { %v1024_v43 = vpop.f32.mrf.mxu0 }
 0x197   : > { %2560 = vmatmul.msk.bf16.vlgmr.msra.gmra.mxu2 %vm691_vm4, %v1176_v55  ;;  %v1696_v55 = vpack.c.bf16 %v1687_v49, %v1686_v52  ;;  %v1133_v18 = vpop.f32.mrf.mxu3  ;;  %v3424_v49 = vld [vmem:[%s3830_s2 + $0x8] sm:$0xff]  ;;  %1866 = vperm.xlu1 %2771, %v3429_v29  }
 0x198   : > { %1831 = vperm.xlu2 %2772, %v3424_v49   ;;  %vm1917_vm11 = vcmp.gt.f32.partialorder %v3424_v49, 0.0 }
 0x19a   : > { %2624 = vmatmul.msk.bf16.gmra.mxu0 %vm691_vm4, %v1408_v4 }
 0x19d   : > { %2671 = vmatmul.msk.bf16.vlgmr.msrb.gmra.mxu1 %vm1737_vm6, %v1696_v55  ;;  %v1180_v55 = vpack.c.bf16 %v3347_v13, %v3321_v57 }
 0x19f   : > { %v1136_v45 = vpop.f32.mrf.mxu3 }
 0x1a7   : > { %2561 = vmatmul.msk.bf16.gmra.mxu2 %vm691_vm4, %v1177_v7  ;;  %v1138_v4 = vpop.f32.mrf.mxu3 }
 0x1b7   : > { %2562 = vmatmul.msk.bf16.gmra.mxu2 %vm691_vm4, %v1178_v48 }
 0x1c2   : > { %v3402_v7 = vpop.f32.mrf.mxu2 }
 0x1c7   : > { %2563 = vmatmul.msk.bf16.gmra.mxu2 %vm691_vm4, %v1179_v15  ;;  %v1809_v15 = vsel %vm1797_vm7, %v3155_v12, 0.0 }
 0x1ca   : > { %v799_v10 = vpop.f32.mrf.mxu2 }
 0x1cb   : > { %v800_v28 = vadd.f32 %v799_v10, %v3196_v36  ;;  %v1803_v36 = vsel %vm1797_vm7, %v3125_v46, 0.0  ;;  %v1939_v46 = vsel %vm1919_vm10, 1, %v2841_v58 }
 0x1cd   : > { %v928_v41 = vadd.f32 %v3281_v22, %v800_v28  ;;  %v1027_v28 = vpop.f32.mrf.mxu0 }
 0x1cf   : > { %v1042_v48 = vadd.f32 %v1017_v27, %v928_v41  ;;  %v1804_v27 = vadd.f32 %v1803_v36, %v1802_v30  ;;  %v1141_v41 = vpop.f32.mrf.mxu3  ;;  %v1813_v36 = vsel %vm1797_vm7, %v3194_v33, 0.0 }
 0x1d1   : > { %v3435_v22 = vadd.f32 %v1131_v59, %v1042_v48  ;;  %v1791_v59 = vld [vmem:[%s3830_s2 + $0x20] sm:$0xff]  ;;  %v1806_v1 = vadd.f32 %v1805_v60, %v1804_v27 }
 0x1d2   : > { %v801_v50 = vpop.f32.mrf.mxu2  ;;  %1846 = vperm.xlu2 %2772, %v1791_v59   ;;  %vm1920_vm9 = vcmp.gt.f32.partialorder %v1791_v59, 0.0 }
 0x1d3   : > { %v802_v52 = vadd.f32 %v801_v50, %v3221_v51  ;;  %v1936_v51 = vsel %vm1916_vm8, 1, %v2841_v58  ;;  %v1940_v21 = vsel %vm1920_vm9, 1, %v2841_v58 }
 0x1d4   : > { %1947 = vperm.xlu1 %2771, %v1936_v51   ;;  %v1937_v51 = vsel %vm1917_vm11, 1, %v2841_v58 }
 0x1d5   : > { %v929_v61 = vadd.f32 %v3296_v37, %v802_v52  ;;  %v3455_v37 = vld [vmem:[%s3830_s2 + $0x10] sm:$0xff] }
 0x1d6   : > { %1836 = vperm.xlu0 %2773, %v3455_v37   ;;  %vm1918_vm1 = vcmp.gt.f32.partialorder %v3455_v37, 0.0 }
 0x1d7   : > { %v1043_v63 = vadd.f32 %v1019_v14, %v929_v61  ;;  %2564 = vmatmul.msk.bf16.gmra.mxu2 %vm691_vm4, %v1180_v55  ;;  %v1808_v14 = vadd.f32 %v1807_v34, %v1806_v1  ;;  %v1143_v61 = vpop.f32.mrf.mxu3 }
 0x1d9   : > { %v3450_v57 = vadd.f32 %v1133_v18, %v1043_v63  ;;  %v3465_v18 = vld [vmem:[%s3830_s2 + $0x30] sm:$0xff]  ;;  %v1810_v10 = vadd.f32 %v1809_v15, %v1808_v14  ;;  %v1794_v63 = vld [vmem:[%s3830_s2 + $0x38] sm:$0xff]  ;;  %v1669_v15 = vpop.permute.xlu2 %1668 }
 0x1da   : > { %v804_v13 = vpop.f32.mrf.mxu2  ;;  %1856 = vperm.xlu2 %2772, %v3465_v18   ;;  %vm1923_vm12 = vcmp.gt.f32.partialorder %v1794_v63, 0.0  ;;  %vm1922_vm14 = vcmp.gt.f32.partialorder %v3465_v18, 0.0 }
 0x1db   : > { %v805_v47 = vadd.f32 %v804_v13, %v3241_v0  ;;  %v1811_v0 = vsel %vm1797_vm7, %v3181_v26, 0.0  ;;  %v1943_v1 = vsel %vm1923_vm12, 1, %v2841_v58  ;;  %v1942_v17 = vsel %vm1922_vm14, 1, %v2841_v58 }
 0x1dc   : > { %1959 = vperm.xlu1 %2771, %v1940_v21   ;;  %v1812_v30 = vadd.f32 %v1811_v0, %v1810_v10  ;;  %v1941_v21 = vsel %vm1921_vm13, 1, %v2841_v58 }
 0x1dd   : > { %v930_v19 = vadd.f32 %v3311_v53, %v805_v47  ;;  %v1688_v53 = vmul.f32 %v3340_v5, %v3103_v35  ;;  %v3486_v35 = vld [vmem:[%s3830_s2 + $0x48] sm:$0xff]  ;;  %v918_v5 = vpop.f32.mrf.mxu1 }
 0x1de   : > { %1861 = vperm.xlu0 %2773, %v1794_v63   ;;  %vm1925_vm2 = vcmp.gt.f32.partialorder %v3486_v35, 0.0 }
 0x1df   : > { %v1044_v39 = vadd.f32 %v1022_v32, %v930_v19  ;;  %v1697_v50 = vpack.c.bf16 %v1689_v56, %v1688_v53  ;;  %v1146_v19 = vpop.f32.mrf.mxu3  ;;  %v1945_v37 = vsel %vm1925_vm2, 1, %v2841_v58 }
 0x1e1   : > { %v3475_v32 = vadd.f32 %v1136_v45, %v1044_v39  ;;  %v1029_v45 = vpop.f32.mrf.mxu0 }
 0x1e2   : > { %v806_v38 = vpop.f32.mrf.mxu2  ;;  %1871 = vperm.xlu2 %2772, %v3486_v35  }
 0x1e3   : > { %v807_v48 = vadd.f32 %v806_v38, %v3265_v9  ;;  %v1814_v9 = vadd.f32 %v1813_v36, %v1812_v30 }
 0x1e4   : > { %1956 = vperm.xlu1 %2771, %v1939_v46  }
 0x1e5   : > { %v931_v52 = vadd.f32 %v3332_v62, %v807_v48  ;;  %v1815_v62 = vsel %vm1797_vm7, %v3152_v11, 0.0  ;;  %v920_v34 = vpop.f32.mrf.mxu1 }
 0x1e6   : > { %v1816_v60 = vadd.f32 %v1815_v62, %v1814_v9  ;;  %2774 = vset.pattern.permute.xlu0 %v2840_v31 }
 0x1e7   : > { %v1045_v55 = vadd.f32 %v1024_v43, %v931_v52  ;;  %2672 = vmatmul.msk.bf16.vlgmr.msrb.gmra.mxu2 %vm1737_vm6, %v1697_v50  ;;  %v1148_v38 = vpop.f32.mrf.mxu3 }
 0x1e9   : > { %v3492_v44 = vadd.f32 %v1138_v4, %v1045_v55  ;;  %v1817_v4 = vrot.slane %v1816_v60, 4  ;;  %v1032_v14 = vpop.f32.mrf.mxu0 }
 0x1ea   : > { %v809_v3 = vpop.f32.mrf.mxu2  ;;  %1950 = vperm.xlu2 %2772, %v1937_v51  }
 0x1eb   : > { %v810_v27 = vadd.f32 %v809_v3, %v3285_v25  ;;  %v1818_v47 = vadd.f32 %v1817_v4, %v1816_v60 }
 0x1ec   : > { %1968 = vperm.xlu1 %2771, %v1943_v1  }
 0x1ed   : > { %v932_v43 = vadd.f32 %v3344_v8, %v810_v27  ;;  %v1819_v10 = vrot.slane %v1818_v47, 2  ;;  %v923_v53 = vpop.f32.mrf.mxu1 }
 0x1ef   : > { %v1046_v59 = vadd.f32 %v1027_v28, %v932_v43  ;;  %v1820_v0 = vadd.f32 %v1819_v10, %v1818_v47  ;;  %v1151_v3 = vpop.f32.mrf.mxu3 }
 0x1f1   : > { %v3502_v25 = vadd.f32 %v1141_v41, %v1046_v59  ;;  %v1034_v56 = vpop.f32.mrf.mxu0  ;;  %v1821_v20 = vrot.slane %v1820_v0, 1  ;;  %v1692_v41 = vmul.f32 %v1669_v15, %v3155_v12 }
 0x1f2   : > { %v811_v8 = vpop.f32.mrf.mxu2  ;;  %1962 = vperm.xlu2 %2772, %v1941_v21  }
 0x1f3   : > { %v812_v13 = vadd.f32 %v811_v8, %v3305_v42  ;;  %v1822_v50 = vadd.f32 %v1821_v20, %v1820_v0 }
 0x1f5   : > { %v933_v49 = vadd.f32 %v3368_v24, %v812_v13  ;;  %v925_v18 = vpop.f32.mrf.mxu1  ;;  %v1823_v46 = vadd.f32 0.0005, %v1822_v50 }
 0x1f7   : > { %v1047_v39 = vadd.f32 %v1029_v45, %v933_v49  ;;  %2673 = vmatmul.msk.bf16.gmra.mxu2 %vm1737_vm6, %v1698_v23  ;;  %v1674_v23 = vpop.permute.xlu2 %1673  ;;  %2807 = vrcp.f32 %v1823_v46  ;;  %v1153_v8 = vpop.f32.mrf.mxu3 }
 0x1f8   : > { %v1693_v48 = vmul.f32 %v1674_v23, %v3181_v26 }
 0x1f9   : > { %v3513_v42 = vadd.f32 %v1143_v61, %v1047_v39  ;;  %v1037_v12 = vpop.f32.mrf.mxu0  ;;  %v1684_v61 = vpop.permute.xlu0 %1683 }
 0x1fa   : > { %v814_v28 = vpop.f32.mrf.mxu2  ;;  %1965 = vperm.xlu2 %2772, %v1942_v17   ;;  %v1699_v52 = vpack.c.bf16 %v1693_v48, %v1692_v41  ;;  %v1695_v59 = vmul.f32 %v1684_v61, %v3152_v11 }
 0x1fb   : > { %v815_v24 = vadd.f32 %v814_v28, %v3314_v54 }
 0x1fd   : > { %v934_v6 = vadd.f32 %v918_v5, %v815_v24  ;;  %v1944_v5 = vsel %vm1924_vm15, 1, %v2841_v58  ;;  %v2808_v27 = vpop.eup %2807  ;;  %v1359_v29 = vpop.f32.mrf.mxu1 }
 0x1fe   : > { %1912 = vperm.xlu0 %2774, %v2808_v27   ;;  %v1827_v27 = vpop.permute.xlu1 %1826 }
 0x1ff   : > { %v1048_v31 = vadd.f32 %v1032_v14, %v934_v6  ;;  %v1679_v60 = vpop.permute.xlu2 %1678  ;;  %v1938_v14 = vsel %vm1918_vm1, 1, %v2841_v58  ;;  %v1587_v39 = vpop.f32.mrf.mxu3 }
 0x200   : > { %v1694_v63 = vmul.f32 %v1679_v60, %v3194_v33 }
 0x201   : > { %v3520_v30 = vadd.f32 %v1146_v19, %v1048_v31  ;;  %v1039_v4 = vpop.f32.mrf.mxu0 }
 0x202   : > { %v816_v54 = vpop.f32.mrf.mxu2  ;;  %1971 = vperm.xlu2 %2772, %v1944_v5   ;;  %v1700_v13 = vpack.c.bf16 %v1695_v59, %v1694_v63 }
 0x203   : > { %v817_v36 = vadd.f32 %v816_v54, %v3336_v2 }
 0x205   : > { %v935_v55 = vadd.f32 %v920_v34, %v817_v36  ;;  %v1361_v11 = vpop.f32.mrf.mxu1 }
 0x206   : > { %2775 = vset.pattern.permute.xlu0 %v2841_v58  ;;  %v1842_v59 = vpop.permute.xlu1 %1841 }
 0x207   : > { %v1049_v9 = vadd.f32 %v1034_v56, %v935_v55  ;;  %2674 = vmatmul.msk.bf16.gmra.mxu2 %vm1737_vm6, %v1699_v52  ;;  %1953 = vperm.xlu0 %2775, %v1938_v14   ;;  %v3563_v5 = vpop.f32.mrf.mxu3 }
 0x209   : > { %v1163_v26 = vadd.f32 %v1148_v38, %v1049_v9  ;;  %v1473_v19 = vpop.f32.mrf.mxu0 }
 0x20a   : > { %v819_v62 = vpop.f32.mrf.mxu2 }
 0x20b   : > { %v820_v2 = vadd.f32 %v819_v62, %v3351_v16 }
 0x20d   : > { %v936_v45 = vadd.f32 %v923_v53, %v820_v2  ;;  %v1364_v0 = vpop.f32.mrf.mxu1 }
 0x20f   : > { %v1050_v43 = vadd.f32 %v1037_v12, %v936_v45  ;;  %1974 = vperm.xlu0 %2775, %v1945_v37  }
 0x211   : > { %v1164_v51 = vadd.f32 %v1151_v3, %v1050_v43 }
 0x212   : > { %v821_v1 = vpop.f32.mrf.mxu2 }
 0x213   : > { %v822_v34 = vadd.f32 %v821_v1, %v3372_v40 }
 0x215   : > { %v937_v47 = vadd.f32 %v925_v18, %v822_v34  ;;  %v1366_v31 = vpop.f32.mrf.mxu1 }
 0x217   : > { %v1051_v16 = vadd.f32 %v1039_v4, %v937_v47  ;;  %2675 = vmatmul.msk.bf16.gmra.mxu2 %vm1737_vm6, %v1700_v13  ;;  %v1852_v13 = vpop.permute.xlu1 %1851 }
 0x219   : > { %v1165_v33 = vadd.f32 %v1153_v8, %v1051_v16 }
 0x21a   : > { %v1245_v49 = vpop.f32.mrf.mxu2 }
 0x21b   : > { %v1270_v15 = vadd.f32 %v1245_v49, %v3435_v22 }
 0x21d   : > { %v1384_v40 = vadd.f32 %v1359_v29, %v1270_v15  ;;  %v1369_v58 = vpop.f32.mrf.mxu1 }
 0x21f   : > { %v1498_v21 = vadd.f32 %v1473_v19, %v1384_v40  ;;  %v1867_v19 = vpop.permute.xlu1 %1866 }
 0x221   : > { %v3537_v10 = vadd.f32 %v1587_v39, %v1498_v21 }
 0x222   : > { %v1247_v28 = vpop.f32.mrf.mxu2 }
 0x223   : > { %v1271_v24 = vadd.f32 %v1247_v28, %v3450_v57 }
 0x225   : > { %v3540_v53 = vadd.f32 %v1361_v11, %v1271_v24  ;;  %v1371_v57 = vpop.f32.mrf.mxu1 }
 0x22a   : > { %v1250_v6 = vpop.f32.mrf.mxu2 }
 0x22b   : > { %v1272_v22 = vadd.f32 %v1250_v6, %v3475_v32 }
 0x22d   : > { %v3543_v56 = vadd.f32 %v1364_v0, %v1272_v22  ;;  %v1374_v52 = vpop.f32.mrf.mxu1 }
 0x232   : > { %v1252_v17 = vpop.f32.mrf.mxu2 }
 0x233   : > { %v1273_v35 = vadd.f32 %v1252_v17, %v3492_v44 }
 0x235   : > { %v3546_v20 = vadd.f32 %v1366_v31, %v1273_v35  ;;  %v3565_v12 = vpop.f32.mrf.mxu1 }
 0x23a   : > { %v1255_v23 = vpop.f32.mrf.mxu2 }
 0x23b   : > { %v1274_v38 = vadd.f32 %v1255_v23, %v3502_v25  ;;  %v3561_v25 = vpop.f32.mrf.mxu0 }
 0x23d   : > { %v3549_v41 = vadd.f32 %v1369_v58, %v1274_v38  ;;  %v3573_v45 = vpop.f32.mrf.mxu1 }
 0x242   : > { %v1257_v48 = vpop.f32.mrf.mxu2 }
 0x243   : > { %v1275_v54 = vadd.f32 %v1257_v48, %v3513_v42  ;;  %v3569_v3 = vpop.f32.mrf.mxu0 }
 0x245   : > { %v3552_v36 = vadd.f32 %v1371_v57, %v1275_v54  ;;  %v3579_v29 = vpop.f32.mrf.mxu1 }
 0x246   : > { %v3600_v54 = vpop.permute.xlu1 %1947 }
 0x247   : > { %vm1976_vm4 = vcmp.eq.s32.totalorder %v3600_v54, 1 }
 0x248   : > { %v1837_v28 = vpop.permute.xlu0 %1836 }
 0x24a   : > { %v1260_v32 = vpop.f32.mrf.mxu2 }
 0x24b   : > { %v1276_v50 = vadd.f32 %v1260_v32, %v3520_v30  ;;  %v3571_v30 = vpop.f32.mrf.mxu3  ;;  %v3575_v60 = vpop.f32.mrf.mxu0 }
 0x24d   : > { %v3555_v55 = vadd.f32 %v1374_v52, %v1276_v50  ;;  %v1762_v34 = vpop.f32.mrf.mxu1 }
 0x252   : > { %v1262_v44 = vpop.f32.mrf.mxu2 }
 0x253   : > { %v3557_v18 = vadd.f32 %v1262_v44, %v1163_v26  ;;  %v1832_v26 = vpop.permute.xlu2 %1831  ;;  %v3577_v43 = vpop.f32.mrf.mxu3 }
 0x255   : > { %v1764_v11 = vpop.f32.mrf.mxu1 }
 0x25a   : > { %v1265_v46 = vpop.f32.mrf.mxu2 }
 0x25b   : > { %v3559_v9 = vadd.f32 %v1265_v46, %v1164_v51  ;;  %v1847_v63 = vpop.permute.xlu2 %1846  ;;  %v3581_v51 = vpop.f32.mrf.mxu0 }
 0x25c   : > { %v3583_v4 = vpop.f32.mrf.mxu3 }
 0x262   : > { %v1267_v42 = vpop.f32.mrf.mxu2 }
 0x263   : > { %v3567_v62 = vadd.f32 %v1267_v42, %v1165_v33  ;;  %v1857_v8 = vpop.permute.xlu2 %1856  ;;  %v3585_v16 = vpop.f32.mrf.mxu0  ;;  %v2803_v33 = vld [vmem:[%s3837_s9] ss:$0 sm:$0xff] }
 0x264   : > { %v3587_v14 = vpop.f32.mrf.mxu3  ;;  %v1763_v40 = vadd.f32 %v2803_v33, %v1762_v34  ;;  %v1765_v39 = vadd.f32 %v2803_v33, %v1764_v11 }
 0x266   : > { %v1874_v24 = vmul.f32 %v1827_v27, %v1763_v40  ;;  %v1875_v0 = vmul.f32 %v1832_v26, %v1765_v39 }
 0x268   : > { %v1884_v58 = vsel %vm470_vm0, %v1874_v24, 0.0  ;;  %v1885_v23 = vsel %vm470_vm0, %v1875_v0, 0.0 }
 0x269   : > { %v1886_v46 = vadd.f32 %v1885_v23, %v1884_v58 }
 0x26a   : > { %v1767_v2 = vpop.f32.mrf.mxu2 }
 0x26b   : > { %v1872_v15 = vpop.permute.xlu2 %1871  ;;  %v3592_v21 = vpop.f32.mrf.mxu0  ;;  %v1768_v37 = vadd.f32 %v2803_v33, %v1767_v2 }
 0x26c   : > { %v3594_v22 = vpop.f32.mrf.mxu3 }
 0x26d   : > { %v1876_v17 = vmul.f32 %v1837_v28, %v1768_v37 }
 0x26f   : > { %v1887_v32 = vsel %vm470_vm0, %v1876_v17, 0.0 }
 0x270   : > { %v1888_v27 = vadd.f32 %v1887_v32, %v1886_v46  ;;  %v1391_v46 = vadd.f32 %v3565_v12, %v3557_v18  ;;  %v1393_v18 = vadd.f32 %v3579_v29, %v3567_v62  ;;  %v1504_v12 = vadd.f32 %v3592_v21, %v3555_v55 }
 0x272   : > { %v1769_v61 = vpop.f32.mrf.mxu2 }
 0x273   : > { %v1770_v6 = vadd.f32 %v2803_v33, %v1769_v61  ;;  %v3598_v48 = vpop.permute.xlu2 %1950  ;;  %v1490_v44 = vpop.f32.mrf.mxu0 }
 0x274   : > { %v1862_v61 = vpop.permute.xlu0 %1861  ;;  %v1604_v11 = vpop.f32.mrf.mxu3  ;;  %vm1977_vm3 = vcmp.eq.s32.totalorder %v3598_v48, 1 }
 0x275   : > { %v1877_v38 = vmul.f32 %v1842_v59, %v1770_v6 }
 0x277   : > { %v1889_v42 = vsel %vm470_vm0, %v1877_v38, 0.0 }
 0x278   : > { %v1890_v40 = vadd.f32 %v1889_v42, %v1888_v27  ;;  %v1499_v42 = vadd.f32 %v3561_v25, %v3540_v53  ;;  %v1503_v53 = vadd.f32 %v3585_v16, %v3552_v36 }
 0x27a   : > { %v1772_v1 = vpop.f32.mrf.mxu2 }
 0x27b   : > { %v1773_v35 = vadd.f32 %v2803_v33, %v1772_v1  ;;  %v3607_v24 = vpop.permute.xlu2 %1962 }
 0x27c   : > { %v1913_v38 = vpop.permute.xlu0 %1912  ;;  %v1607_v32 = vpop.f32.mrf.mxu3  ;;  %vm1981_vm5 = vcmp.eq.s32.totalorder %v3607_v24, 1 }
 0x27d   : > { %v1878_v50 = vmul.f32 %v1847_v63, %v1773_v35 }
 0x27f   : > { %v1891_v59 = vsel %vm470_vm0, %v1878_v50, 0.0 }
 0x280   : > { %v1892_v63 = vadd.f32 %v1891_v59, %v1890_v40 }
 0x282   : > { %v1774_v47 = vpop.f32.mrf.mxu2 }
 0x283   : > { %v1775_v57 = vadd.f32 %v2803_v33, %v1774_v47 }
 0x284   : > { %v1609_v16 = vpop.f32.mrf.mxu3 }
 0x285   : > { %v1879_v2 = vmul.f32 %v1852_v13, %v1775_v57  ;;  %v3609_v13 = vpop.permute.xlu1 %1959 }
 0x286   : > { %vm1980_vm7 = vcmp.eq.s32.totalorder %v3609_v13, 1 }
 0x287   : > { %v1893_v39 = vsel %vm470_vm0, %v1879_v2, 0.0  ;;  %v1392_v2 = vadd.f32 %v3573_v45, %v3559_v9  ;;  %v1505_v45 = vadd.f32 %v1490_v44, %v1391_v46 }
 0x288   : > { %v1894_v0 = vadd.f32 %v1893_v39, %v1892_v63 }
 0x289   : > { %v3655_v44 = vadd.f32 %v1604_v11, %v1505_v45 }
 0x28a   : > { %v1777_v49 = vpop.f32.mrf.mxu2 }
 0x28b   : > { %v1778_v52 = vadd.f32 %v2803_v33, %v1777_v49 }
 0x28d   : > { %v1880_v34 = vmul.f32 %v1857_v8, %v1778_v52 }
 0x28f   : > { %v1895_v49 = vsel %vm470_vm0, %v1880_v34, 0.0 }
 0x290   : > { %v1896_v17 = vadd.f32 %v1895_v49, %v1894_v0 }
 0x292   : > { %v1779_v31 = vpop.f32.mrf.mxu2 }
 0x293   : > { %v1780_v26 = vadd.f32 %v2803_v33, %v1779_v31  ;;  %v1493_v31 = vpop.f32.mrf.mxu0 }
 0x295   : > { %v1881_v37 = vmul.f32 %v1862_v61, %v1780_v26  ;;  %v3620_v26 = vpop.permute.xlu2 %1965  ;;  %v1501_v61 = vadd.f32 %v3575_v60, %v3546_v20  ;;  %v3638_v20 = vadd.f32 %v3563_v5, %v1499_v42  ;;  %v1954_v60 = vpop.permute.xlu0 %1953  ;;  %v3653_v5 = vadd.f32 %v3594_v22, %v1504_v12 }
 0x296   : > { %vm1982_vm8 = vcmp.eq.s32.totalorder %v3620_v26, 1  ;;  %vm1978_vm12 = vcmp.eq.s32.totalorder %v1954_v60, 1 }
 0x297   : > { %v1897_v6 = vsel %vm470_vm0, %v1881_v37, 0.0  ;;  %v3644_v36 = vadd.f32 %v3577_v43, %v1501_v61 }
 0x298   : > { %v1898_v23 = vadd.f32 %v1897_v6, %v1896_v17 }
 0x29a   : > { %v1782_v1 = vpop.f32.mrf.mxu2 }
 0x29b   : > { %v1783_v47 = vadd.f32 %v2803_v33, %v1782_v1  ;;  %v1502_v1 = vadd.f32 %v3581_v51, %v3549_v41  ;;  %v1495_v9 = vpop.f32.mrf.mxu0  ;;  %v1506_v41 = vadd.f32 %v1493_v31, %v1392_v2  ;;  %v3650_v51 = vadd.f32 %v3587_v14, %v1503_v53 }
 0x29c   : > { %v1507_v55 = vadd.f32 %v1495_v9, %v1393_v18 }
 0x29d   : > { %v1882_v28 = vmul.f32 %v1867_v19, %v1783_v47  ;;  %v3647_v29 = vadd.f32 %v3583_v4, %v1502_v1  ;;  %v3663_v59 = vadd.f32 %v1607_v32, %v1506_v41  ;;  %v1972_v40 = vpop.permute.xlu2 %1971 }
 0x29e   : > { %v3674_v47 = vadd.f32 %v1609_v16, %v1507_v55  ;;  %vm1984_vm10 = vcmp.eq.s32.totalorder %v1972_v40, 1 }
 0x29f   : > { %v1899_v35 = vsel %vm470_vm0, %v1882_v28, 0.0 }
 0x2a0   : > { %v1900_v50 = vadd.f32 %v1899_v35, %v1898_v23 }
 0x2a2   : > { %v1784_v8 = vpop.f32.mrf.mxu2 }
 0x2a3   : > { %v1785_v58 = vadd.f32 %v2803_v33, %v1784_v8  ;;  %v1957_v33 = vpop.permute.xlu1 %1956 }
 0x2a4   : > { %vm1979_vm9 = vcmp.eq.s32.totalorder %v1957_v33, 1 }
 0x2a5   : > { %v1883_v57 = vmul.f32 %v1872_v15, %v1785_v58  ;;  %v1500_v15 = vadd.f32 %v3569_v3, %v3543_v56  ;;  %v2802_v56 = vld [vmem:[%s3835_s7] ss:$0 sm:$0xff]  ;;  %v1975_v58 = vpop.permute.xlu0 %1974 }
 0x2a6   : > { %v3661_v43 = vadd.f32 %v2802_v56, %v3638_v20  ;;  %v3669_v14 = vadd.f32 %v2802_v56, %v3644_v36  ;;  %v3672_v22 = vadd.f32 %v2802_v56, %v3647_v29  ;;  %v3677_v11 = vadd.f32 %v2802_v56, %v3650_v51 }
 0x2a7   : > { %v1901_v19 = vsel %vm470_vm0, %v1883_v57, 0.0  ;;  %v3641_v62 = vadd.f32 %v3571_v30, %v1500_v15  ;;  %v3658_v30 = vadd.f32 %v2802_v56, %v3537_v10  ;;  %v3682_v63 = vadd.f32 %v2802_v56, %v3653_v5 }
 0x2a8   : > { %v1902_v52 = vadd.f32 %v1901_v19, %v1900_v50  ;;  %v3685_v49 = vadd.f32 %v2802_v56, %v3655_v44  ;;  %v3690_v28 = vadd.f32 %v2802_v56, %v3663_v59  ;;  %v3694_v6 = vadd.f32 %v2802_v56, %v3674_v47 }
 0x2a9   : > { %v3666_v34 = vadd.f32 %v2802_v56, %v3641_v62  ;;  %vm1985_vm13 = vcmp.eq.s32.totalorder %v1975_v58, 1 }
 0x2aa   : > { %v1903_v27 = vrot.slane %v1902_v52, 4 }
 0x2ab   : > { %v1969_v39 = vpop.permute.xlu1 %1968 }
 0x2ac   : > { %v1904_v25 = vadd.f32 %v1903_v27, %v1902_v52  ;;  %vm1983_vm11 = vcmp.eq.s32.totalorder %v1969_v39, 1 }
 0x2ae   : > { %v1905_v3 = vrot.slane %v1904_v25, 2 }
 0x2b0   : > { %v1906_v21 = vadd.f32 %v1905_v3, %v1904_v25 }
 0x2b2   : > { %v1907_v4 = vrot.slane %v1906_v21, 1 }
 0x2b4   : > { %v1908_v37 = vadd.f32 %v1907_v4, %v1906_v21 }
 0x2b6   : > { %v1915_v0 = vmul.f32 %v1913_v38, %v1908_v37 }
 0x2b8   : > { %v1928_v31 = vmul.f32 %v1915_v0, %v3666_v34  ;;  %v1929_v17 = vmul.f32 %v1915_v0, %v3669_v14  ;;  %v1932_v8 = vmul.f32 %v1915_v0, %v3682_v63  ;;  %v1933_v35 = vmul.f32 %v1915_v0, %v3685_v49 }
 0x2b9   : > { %v1926_v23 = vmul.f32 %v1915_v0, %v3658_v30  ;;  %v1927_v57 = vmul.f32 %v1915_v0, %v3661_v43  ;;  %v1930_v38 = vmul.f32 %v1915_v0, %v3672_v22  ;;  %v1931_v32 = vmul.f32 %v1915_v0, %v3677_v11 }
 0x2ba   : > { %v1988_v50 = vsel %vm1978_vm12, %v1928_v31, -1e+30  ;;  %v1989_v19 = vsel %vm1979_vm9, %v1929_v17, -1e+30  ;;  %v1992_v52 = vsel %vm1982_vm8, %v1932_v8, -1e+30  ;;  %v1934_v46 = vmul.f32 %v1915_v0, %v3690_v28 }
 0x2bb   : > { %v1993_v42 = vsel %vm1983_vm11, %v1933_v35, -1e+30  ;;  %v1998_v2 = vsel %vm470_vm0, %v1988_v50, -inf  ;;  %v1999_v27 = vsel %vm470_vm0, %v1989_v19, -inf  ;;  %v2004_v15 = vsel %vm470_vm0, %v1992_v52, -inf }
 0x2bc   : > { %v2006_v61 = vsel %vm470_vm0, %v1993_v42, -inf  ;;  %v1935_v1 = vmul.f32 %v1915_v0, %v3694_v6  ;;  %v1986_v33 = vsel %vm1976_vm4, %v1926_v23, -1e+30  ;;  %v1987_v26 = vsel %vm1977_vm3, %v1927_v57, -1e+30 }
 0x2bd   : > { %v1990_v18 = vsel %vm1980_vm7, %v1930_v38, -1e+30  ;;  %v1991_v53 = vsel %vm1981_vm5, %v1931_v32, -1e+30  ;;  %v1994_v9 = vsel %vm1984_vm10, %v1934_v46, -1e+30  ;;  %v2005_v41 = vmax.f32 %v1998_v2, %v2004_v15 }
 0x2be   : > { %v1995_v25 = vsel %vm1985_vm13, %v1935_v1, -1e+30  ;;  %v1996_v12 = vsel %vm470_vm0, %v1986_v33, -inf  ;;  %v1997_v45 = vsel %vm470_vm0, %v1987_v26, -inf  ;;  %v2000_v56 = vsel %vm470_vm0, %v1990_v18, -inf }
 0x2bf   : > { %v2002_v54 = vsel %vm470_vm0, %v1991_v53, -inf  ;;  %v2007_v48 = vmax.f32 %v1999_v27, %v2006_v61  ;;  %v2001_v3 = vmax.f32 %v1996_v12, %v2000_v56  ;;  %v2008_v13 = vsel %vm470_vm0, %v1994_v9, -inf }
 0x2c0   : > { %v2003_v60 = vmax.f32 %v1997_v45, %v2002_v54  ;;  %v2010_v24 = vsel %vm470_vm0, %v1995_v25, -inf }
 0x2c1   : > { %v2009_v55 = vmax.f32 %v2001_v3, %v2008_v13  ;;  %v2013_v21 = vmax.f32 %v2005_v41, %v2007_v48 }
 0x2c2   : > { %v2011_v16 = vmax.f32 %v2003_v60, %v2010_v24 }
 0x2c4   : > { %v2012_v4 = vmax.f32 %v2009_v55, %v2011_v16 }
 0x2c6   : > { %v2014_v40 = vmax.f32 %v2012_v4, %v2013_v21 }
 0x2c8   : > { %v2015_v39 = vrot.slane %v2014_v40, 4 }
 0x2ca   : > { %v2016_v37 = vmax.f32 %v2014_v40, %v2015_v39 }
 0x2cc   : > { %v2017_v0 = vrot.slane %v2016_v37, 2 }
 0x2ce   : > { %v2018_v31 = vmax.f32 %v2016_v37, %v2017_v0 }
 0x2d0   : > { %v2019_v17 = vrot.slane %v2018_v31, 1 }
 0x2d2   : > { %v2020_v8 = vmax.f32 %v2018_v31, %v2019_v17 }
 0x2d4   : > { %v2021_v35 = vsub.f32 %v1986_v33, %v2020_v8  ;;  %v2022_v58 = vsub.f32 %v1987_v26, %v2020_v8  ;;  %v2023_v23 = vsub.f32 %v1988_v50, %v2020_v8  ;;  %v2024_v57 = vsub.f32 %v1989_v19, %v2020_v8 }
 0x2d5   : > { %v2025_v38 = vsub.f32 %v1990_v18, %v2020_v8  ;;  %v2026_v2 = vsub.f32 %v1991_v53, %v2020_v8  ;;  %v2027_v61 = vsub.f32 %v1992_v52, %v2020_v8  ;;  %v2028_v12 = vsub.f32 %v1993_v42, %v2020_v8 }
 0x2d6   : > { %v2031_v32 = vmul.f32 1.442695, %v2021_v35  ;;  %v2033_v46 = vmul.f32 1.442695, %v2022_v58  ;;  %v2035_v27 = vmul.f32 1.442695, %v2023_v23  ;;  %v2029_v56 = vsub.f32 %v1994_v9, %v2020_v8 }
 0x2d7   : > { %v2037_v15 = vmul.f32 1.442695, %v2024_v57  ;;  %v2039_v1 = vmul.f32 1.442695, %v2025_v38  ;;  %v2041_v45 = vmul.f32 1.442695, %v2026_v2  ;;  %v2030_v19 = vsub.f32 %v1995_v25, %v2020_v8 }
 0x2d8   : > { %2809 = vpow2.f32 %v2031_v32  ;;  %v2043_v33 = vmul.f32 1.442695, %v2027_v61  ;;  %v2045_v18 = vmul.f32 1.442695, %v2028_v12  ;;  %v2047_v48 = vmul.f32 1.442695, %v2029_v56 }
 0x2d9   : > { %2811 = vpow2.f32 %v2033_v46  ;;  %v2049_v9 = vmul.f32 1.442695, %v2030_v19 }
 0x2da   : > { %2813 = vpow2.f32 %v2035_v27 }
 0x2db   : > { %2815 = vpow2.f32 %v2037_v15 }
 0x2dc   : > { %2817 = vpow2.f32 %v2039_v1 }
 0x2dd   : > { %2819 = vpow2.f32 %v2041_v45 }
 0x2de   : > { %v2810_v26 = vpop.eup %2809  ;;  %2821 = vpow2.f32 %v2043_v33 }
 0x2df   : > { %v2812_v50 = vpop.eup %2811  ;;  %v2051_v53 = vsel %vm470_vm0, %v2810_v26, 0.0  ;;  %2823 = vpow2.f32 %v2045_v18 }
 0x2e0   : > { %v2814_v54 = vpop.eup %2813  ;;  %v2052_v41 = vsel %vm470_vm0, %v2812_v50, 0.0  ;;  %2825 = vpow2.f32 %v2047_v48 }
 0x2e1   : > { %v2816_v52 = vpop.eup %2815  ;;  %v2053_v3 = vadd.f32 %v2052_v41, %v2051_v53  ;;  %v2054_v42 = vsel %vm470_vm0, %v2814_v54, 0.0  ;;  %2827 = vpow2.f32 %v2049_v9 }
 0x2e2   : > { %v2818_v60 = vpop.eup %2817  ;;  %v2056_v24 = vsel %vm470_vm0, %v2816_v52, 0.0 }
 0x2e3   : > { %v2055_v13 = vadd.f32 %v2054_v42, %v2053_v3  ;;  %v2820_v25 = vpop.eup %2819  ;;  %v2058_v16 = vsel %vm470_vm0, %v2818_v60, 0.0 }
 0x2e4   : > { %v2822_v21 = vpop.eup %2821  ;;  %v2060_v40 = vsel %vm470_vm0, %v2820_v25, 0.0 }
 0x2e5   : > { %v2057_v55 = vadd.f32 %v2056_v24, %v2055_v13  ;;  %v2824_v39 = vpop.eup %2823  ;;  %v2062_v0 = vsel %vm470_vm0, %v2822_v21, 0.0 }
 0x2e6   : > { %v2826_v31 = vpop.eup %2825  ;;  %v2064_v8 = vsel %vm470_vm0, %v2824_v39, 0.0 }
 0x2e7   : > { %v2059_v4 = vadd.f32 %v2058_v16, %v2057_v55  ;;  %v2828_v35 = vpop.eup %2827  ;;  %v2066_v23 = vsel %vm470_vm0, %v2826_v31, 0.0 }
 0x2e8   : > { %v2068_v38 = vsel %vm470_vm0, %v2828_v35, 0.0 }
 0x2e9   : > { %v2061_v37 = vadd.f32 %v2060_v40, %v2059_v4 }
 0x2eb   : > { %v2063_v17 = vadd.f32 %v2062_v0, %v2061_v37 }
 0x2ed   : > { %v2065_v58 = vadd.f32 %v2064_v8, %v2063_v17 }
 0x2ef   : > { %v2067_v57 = vadd.f32 %v2066_v23, %v2065_v58 }
 0x2f1   : > { %v2069_v32 = vadd.f32 %v2068_v38, %v2067_v57 }
 0x2f3   : > { %v2070_v46 = vrot.slane %v2069_v32, 4 }
 0x2f5   : > { %v2071_v2 = vadd.f32 %v2070_v46, %v2069_v32 }
 0x2f7   : > { %v2072_v27 = vrot.slane %v2071_v2, 2 }
 0x2f9   : > { %v2073_v15 = vadd.f32 %v2072_v27, %v2071_v2 }
 0x2fb   : > { %v2074_v61 = vrot.slane %v2073_v15, 1 }
 0x2fd   : > { %v2075_v1 = vadd.f32 %v2074_v61, %v2073_v15 }
 0x2ff   : > { %2829 = vrcp.f32 %v2075_v1 }
 0x305   : > { %v2830_v12 = vpop.eup %2829 }
 0x306   : > { %v2081_v45 = vmul.f32 %v2830_v12, %v2818_v60  ;;  %v2082_v56 = vmul.f32 %v2830_v12, %v2820_v25  ;;  %v2079_v33 = vmul.f32 %v2830_v12, %v2814_v54  ;;  %v2080_v19 = vmul.f32 %v2830_v12, %v2816_v52 }
 0x307   : > { %v2077_v18 = vmul.f32 %v2830_v12, %v2810_v26  ;;  %v2078_v53 = vmul.f32 %v2830_v12, %v2812_v50  ;;  %v2085_v60 = vmul.f32 %v2830_v12, %v2826_v31  ;;  %v2086_v25 = vmul.f32 %v2830_v12, %v2828_v35 }
 0x308   : > { %v2091_v41 = vmul.f32 %v2081_v45, %v3672_v22  ;;  %v2092_v48 = vmul.f32 %v2082_v56, %v3677_v11  ;;  %v2089_v3 = vmul.f32 %v2079_v33, %v3666_v34  ;;  %v2090_v42 = vmul.f32 %v2080_v19, %v3669_v14  ;;  %v2804_v33 = vld [vmem:[%s3840_s12] ss:$0 sm:$0xff] }
 0x309   : > { %v2087_v9 = vmul.f32 %v2077_v18, %v3658_v30  ;;  %v2088_v13 = vmul.f32 %v2078_v53, %v3661_v43  ;;  %v2083_v52 = vmul.f32 %v2830_v12, %v2822_v21  ;;  %v2084_v26 = vmul.f32 %v2830_v12, %v2824_v39 }
 0x30a   : > { %v2786_v24 = vpack.i.bf16 %v2092_v48, %v2091_v41  ;;  %v2781_v55 = vpack.i.bf16 %v2090_v42, %v2089_v3  ;;  %v2095_v50 = vmul.f32 %v2085_v60, %v3690_v28  ;;  %v2096_v16 = vmul.f32 %v2086_v25, %v3694_v6 }
 0x30b   : > { %v2776_v54 = vpack.i.bf16 %v2088_v13, %v2087_v9  ;;  %v2093_v4 = vmul.f32 %v2083_v52, %v3682_v63  ;;  %v2094_v40 = vmul.f32 %v2084_v26, %v3685_v49 }
 0x30c   : > { %2787 = vrot.lane.b32.xlu0 %v2786_v24, %s2842_s16  ;;  %2782 = vrot.lane.b32.xlu2 %v2781_v55, %s2842_s16  ;;  %v2796_v37 = vpack.i.bf16 %v2096_v16, %v2095_v50 }
 0x30d   : > { %2777 = vrot.lane.b32.xlu1 %v2776_v54, %s2842_s16  ;;  %v2791_v0 = vpack.i.bf16 %v2094_v40, %v2093_v4 }
 0x314   : > { %2194 = vrot.lane.b32.xlu0 %v3537_v10, %s2843_s17  ;;  %2797 = vrot.lane.b32.xlu2 %v2796_v37, %s2842_s16  ;;  %v2743_v10 = vld [vmem:[%s3838_s10 + $0x18] sm:$0xff] }
 0x315   : > { %2792 = vrot.lane.b32.xlu1 %v2791_v0, %s2842_s16  ;;  %2243 = vmatpush.bf16.msra.mxu1 %v2743_v10  ;;  %s3803_s16 = scalar_lea.vmem %s3841_s13, %s2754_s22 }
 0x31c   : > { %2200 = vrot.lane.b32.xlu0 %v3644_v36, %s2843_s17  ;;  %2198 = vrot.lane.b32.xlu2 %v3641_v62, %s2843_s17  ;;  %v2741_v62 = vld [vmem:[%s3838_s10 + $0x8] sm:$0xff]  ;;  %v2740_v36 = vld [vmem:[%s3838_s10] sm:$0xff] }
 0x31d   : > { %2196 = vrot.lane.b32.xlu1 %v3638_v20, %s2843_s17  ;;  %v2742_v20 = vld [vmem:[%s3838_s10 + $0x10] sm:$0xff] }
 0x31e   : > { %2244 = vmatpush.bf16.msra.mxu1 %v2742_v20 }
 0x322   : > { %2245 = vmatpush.bf16.msra.mxu1 %v2741_v62 }
 0x324   : > { %2206 = vrot.lane.b32.xlu0 %v3653_v5, %s2843_s17  ;;  %2204 = vrot.lane.b32.xlu2 %v3650_v51, %s2843_s17 }
 0x325   : > { %2202 = vrot.lane.b32.xlu1 %v3647_v29, %s2843_s17 }
 0x326   : > { %2246 = vmatpush.bf16.msra.mxu1 %v2740_v36 }
 0x32c   : > { %2212 = vrot.lane.b32.xlu0 %v3674_v47, %s2843_s17  ;;  %2210 = vrot.lane.b32.xlu2 %v3663_v59, %s2843_s17 }
 0x32d   : > { %2208 = vrot.lane.b32.xlu1 %v3655_v44, %s2843_s17 }
 0x366   : > { %v2783_v21 = vpop.permute.xlu2 %2782 }
 0x367   : > { %v2785_v39 = vunpack.i.h.bf16 %v2783_v21  ;;  %v2784_v31 = vunpack.i.l.bf16 %v2783_v21 }
 0x369   : > { %v2139_v17 = vsel %vm470_vm0, %v3666_v34, %v2784_v31  ;;  %v2140_v8 = vsel %vm470_vm0, %v3669_v14, %v2785_v39 }
 0x36a   : > { %v2148_v35 = vpack.c.bf16 %v2140_v8, %v2139_v17 }
 0x37e   : > { %v2788_v58 = vpop.permute.xlu0 %2787 }
 0x37f   : > { %v2778_v29 = vpop.permute.xlu1 %2777  ;;  %v2789_v23 = vunpack.i.l.bf16 %v2788_v58 }
 0x380   : > { %v2780_v51 = vunpack.i.h.bf16 %v2778_v29  ;;  %v2779_v5 = vunpack.i.l.bf16 %v2778_v29 }
 0x381   : > { %v2141_v57 = vsel %vm470_vm0, %v3672_v22, %v2789_v23 }
 0x382   : > { %v2138_v44 = vsel %vm470_vm0, %v3661_v43, %v2780_v51  ;;  %v2137_v59 = vsel %vm470_vm0, %v3658_v30, %v2779_v5  ;;  %v2790_v43 = vunpack.i.h.bf16 %v2788_v58 }
 0x383   : > { %v2147_v47 = vpack.c.bf16 %v2138_v44, %v2137_v59 }
 0x384   : > { %v2142_v30 = vsel %vm470_vm0, %v3677_v11, %v2790_v43  ;;  %v2798_v11 = vpop.permute.xlu2 %2797 }
 0x385   : > { %2692 = vmatmul.msk.bf16.vlgmr.msra.gmra.mxu1 %vm1737_vm6, %v2147_v47  ;;  %v2149_v38 = vpack.c.bf16 %v2142_v30, %v2141_v57  ;;  %v2800_v15 = vunpack.i.h.bf16 %v2798_v11  ;;  %v2799_v61 = vunpack.i.l.bf16 %v2798_v11 }
 0x387   : > { %v2793_v34 = vpop.permute.xlu1 %2792  ;;  %v2146_v22 = vsel %vm470_vm0, %v3694_v6, %v2800_v15  ;;  %v2145_v1 = vsel %vm470_vm0, %v3690_v28, %v2799_v61 }
 0x388   : > { %v2795_v32 = vunpack.i.h.bf16 %v2793_v34  ;;  %v2794_v46 = vunpack.i.l.bf16 %v2793_v34  ;;  %v2151_v12 = vpack.c.bf16 %v2146_v22, %v2145_v1 }
 0x38a   : > { %v2144_v14 = vsel %vm470_vm0, %v3685_v49, %v2795_v32  ;;  %v2143_v2 = vsel %vm470_vm0, %v3682_v63, %v2794_v46  ;;  %v2195_v49 = vpop.permute.xlu0 %2194  ;;  %v2273_v63 = vperm.slane %v3402_v7, 0 }
 0x38b   : > { %v2150_v27 = vpack.c.bf16 %v2144_v14, %v2143_v2 }
 0x38c   : > { %v2199_v48 = vpop.permute.xlu2 %2198 }
 0x38f   : > { %v2197_v6 = vpop.permute.xlu1 %2196 }
 0x392   : > { %v2201_v24 = vpop.permute.xlu0 %2200 }
 0x394   : > { %v2205_v40 = vpop.permute.xlu2 %2204 }
 0x395   : > { %2693 = vmatmul.msk.bf16.gmra.mxu1 %vm1737_vm6, %v2148_v35 }
 0x397   : > { %v2203_v52 = vpop.permute.xlu1 %2202 }
 0x39a   : > { %v2207_v62 = vpop.permute.xlu0 %2206 }
 0x39c   : > { %v2211_v31 = vpop.permute.xlu2 %2210 }
 0x39f   : > { %v2209_v44 = vpop.permute.xlu1 %2208 }
 0x3a2   : > { %v2213_v43 = vpop.permute.xlu0 %2212 }
 0x3a5   : > { %2694 = vmatmul.msk.bf16.gmra.mxu1 %vm1737_vm6, %v2149_v38 }
 0x3b5   : > { %2695 = vmatmul.msk.bf16.gmra.mxu1 %vm1737_vm6, %v2150_v27 }
 0x3c5   : > { %2696 = vmatmul.msk.bf16.gmra.mxu1 %vm1737_vm6, %v2151_v12 }
 0x402   : > { %v2248_v45 = vpop.f32.mrf.mxu1 }
 0x403   : > { %v2249_v56 = vadd.f32 %v2248_v45, %v2195_v49 }
 0x405   : > { %v2274_v19 = vadd.f32 %v2273_v63, %v2249_v56 }
 0x407   : > { %v2288_v28 = vadd.f32 %v2804_v33, %v2274_v19 }
 0x409   : > { %2298 = vst.msk [vmem:[%s3803_s16] sm:$0xff] %vm470_vm0, %v2288_v28 }
 0x40a   : > { %v2250_v18 = vpop.f32.mrf.mxu1 }
 0x40b   : > { %v2251_v7 = vadd.f32 %v2250_v18, %v2197_v6 }
 0x40d   : > { %v2275_v53 = vadd.f32 %v2273_v63, %v2251_v7 }
 0x40f   : > { %v2289_v41 = vadd.f32 %v2804_v33, %v2275_v53 }
 0x411   : > { %2299 = vst.msk [vmem:[%s3803_s16 + $0x8] sm:$0xff] %vm470_vm0, %v2289_v41 }
 0x412   : > { %v2253_v3 = vpop.f32.mrf.mxu1 }
 0x413   : > { %v2254_v42 = vadd.f32 %v2253_v3, %v2199_v48 }
 0x415   : > { %v2276_v9 = vadd.f32 %v2273_v63, %v2254_v42 }
 0x417   : > { %v2290_v13 = vadd.f32 %v2804_v33, %v2276_v9 }
 0x419   : > { %2300 = vst.msk [vmem:[%s3803_s16 + $0x10] sm:$0xff] %vm470_vm0, %v2290_v13 }
 0x41a   : > { %v2255_v55 = vpop.f32.mrf.mxu1 }
 0x41b   : > { %v2256_v60 = vadd.f32 %v2255_v55, %v2201_v24 }
 0x41d   : > { %v2277_v25 = vadd.f32 %v2273_v63, %v2256_v60 }
 0x41f   : > { %v2291_v54 = vadd.f32 %v2804_v33, %v2277_v25 }
 0x421   : > { %2301 = vst.msk [vmem:[%s3803_s16 + $0x18] sm:$0xff] %vm470_vm0, %v2291_v54 }
 0x422   : > { %v2258_v26 = vpop.f32.mrf.mxu1 }
 0x423   : > { %v2259_v50 = vadd.f32 %v2258_v26, %v2203_v52 }
 0x425   : > { %v2278_v16 = vadd.f32 %v2273_v63, %v2259_v50 }
 0x427   : > { %v2292_v4 = vadd.f32 %v2804_v33, %v2278_v16 }
 0x429   : > { %2302 = vst.msk [vmem:[%s3803_s16 + $0x20] sm:$0xff] %vm470_vm0, %v2292_v4 }
 0x42a   : > { %v2260_v37 = vpop.f32.mrf.mxu1 }
 0x42b   : > { %v2261_v0 = vadd.f32 %v2260_v37, %v2205_v40 }
 0x42d   : > { %v2279_v10 = vadd.f32 %v2273_v63, %v2261_v0 }
 0x42f   : > { %v2293_v20 = vadd.f32 %v2804_v33, %v2279_v10 }
 0x431   : > { %2303 = vst.msk [vmem:[%s3803_s16 + $0x28] sm:$0xff] %vm470_vm0, %v2293_v20 }
 0x432   : > { %v2263_v36 = vpop.f32.mrf.mxu1 }
 0x433   : > { %v2264_v29 = vadd.f32 %v2263_v36, %v2207_v62 }
 0x435   : > { %v2280_v51 = vadd.f32 %v2273_v63, %v2264_v29 }
 0x437   : > { %v2294_v5 = vadd.f32 %v2804_v33, %v2280_v51 }
 0x439   : > { %2304 = vst.msk [vmem:[%s3803_s16 + $0x30] sm:$0xff] %vm470_vm0, %v2294_v5 }
 0x43a   : > { %v2265_v59 = vpop.f32.mrf.mxu1 }
 0x43b   : > { %v2266_v47 = vadd.f32 %v2265_v59, %v2209_v44 }
 0x43d   : > { %v2281_v21 = vadd.f32 %v2273_v63, %v2266_v47 }
 0x43f   : > { %v2295_v39 = vadd.f32 %v2804_v33, %v2281_v21 }
 0x441   : > { %2305 = vst.msk [vmem:[%s3803_s16 + $0x38] sm:$0xff] %vm470_vm0, %v2295_v39 }
 0x442   : > { %v2268_v17 = vpop.f32.mrf.mxu1 }
 0x443   : > { %v2269_v8 = vadd.f32 %v2268_v17, %v2211_v31 }
 0x445   : > { %v2282_v35 = vadd.f32 %v2273_v63, %v2269_v8 }
 0x447   : > { %v2296_v58 = vadd.f32 %v2804_v33, %v2282_v35 }
 0x449   : > { %2306 = vst.msk [vmem:[%s3803_s16 + $0x40] sm:$0xff] %vm470_vm0, %v2296_v58 }
 0x44a   : > { %v2270_v23 = vpop.f32.mrf.mxu1 }
 0x44b   : > { %v2271_v30 = vadd.f32 %v2270_v23, %v2213_v43 }
 0x44d   : > { %v2283_v57 = vadd.f32 %v2273_v63, %v2271_v30 }
 0x44f   : > { %v2297_v38 = vadd.f32 %v2804_v33, %v2283_v57 }
 0x451   : > { %2307 = vst.msk [vmem:[%s3803_s16 + $0x48] sm:$0xff] %vm470_vm0, %v2297_v38 }
 0x452 PF: > { %s23_s25 = sadd.s32 1, %s2837_s25  }
 0x453   : > { %p20_p4 = scmp.ge.s32.totalorder %s23_s25, 4  }
 0x455   :  { %22 = sbr.rel (!%p20_p4) target bundleno = 1 (0x1), region = 113 }

</bundles_post_ra>
